<compile_context>
chip_gen: v6e
topology: v6e:2x2x1
jax: 0.10.0
libtpu: 0.0.40
codegen_flags: <defaults>
</compile_context>

<pallas_src>
import jax
import jax.numpy as jnp
from jax import lax
from jax.experimental import pallas as pl
from jax.experimental.pallas import tpu as pltpu

_EPS = 1e-8
_LANE = 128
_SUBLANE = 8


def _round_up(v, m):
    return (v + m - 1) // m * m


def _make_kernel(n_true, c_true, mm_dtype, mm_precision):
    n_f = float(n_true)
    inv_n = 1.0 / n_f
    inv_nm1 = 1.0 / (n_f - 1.0)
    # off-diagonal count (c^2 - c), then the module's final "/ N".
    final_scale = 1.0 / (float(c_true) * float(c_true - 1)) / n_f

    def kernel(x_ref, out_ref, g_ref, s_ref, q_ref):
        step = pl.program_id(0)

        @pl.when(step == 0)
        def _init():
            g_ref[...] = jnp.zeros_like(g_ref)
            s_ref[...] = jnp.zeros_like(s_ref)
            q_ref[...] = jnp.zeros_like(q_ref)

        xt = x_ref[...].astype(jnp.float32)              # (tile_n, Cp)
        xm = xt.astype(mm_dtype)                         # bf16 operands -> faster MXU
        # G += x_tile^T @ x_tile  (contract over the batch tile, f32 accumulation)
        g_ref[...] += lax.dot_general(
            xm, xm,
            dimension_numbers=(((0,), (0,)), ((), ())),
            preferred_element_type=jnp.float32,
            precision=mm_precision)
        s_ref[...] += jnp.sum(xt, axis=0, keepdims=True)
        q_ref[...] += jnp.sum(xt * xt, axis=0, keepdims=True)

        @pl.when(step == pl.num_programs(0) - 1)
        def _finalize():
            g = g_ref[...]                               # (Cp, Cp)
            s = s_ref[...]                               # (1, Cp)
            q = q_ref[...]                               # (1, Cp)

            # rank-1 outer product S^T S via a K=1 matmul (avoids any transpose)
            outer = lax.dot_general(
                s, s,
                dimension_numbers=(((0,), (0,)), ((), ())),
                preferred_element_type=jnp.float32,
                precision=lax.Precision.HIGHEST)         # (Cp, Cp)
            cg = g - outer * inv_n                       # centered Gram == xc^T xc

            diag_cg = q - (s * s) * inv_n                # exact diag(cg), (1, Cp)
            var = diag_cg * inv_nm1                      # unbiased variance
            w = 1.0 / (_EPS + var)                       # 1 / (eps + var)

            # sum_ij corr_ij^2 = sum_ij cg_ij^2 * w_i * w_j, without any C x C
            # iota/diagonal mask: scale columns by w_j, reduce rows, dot with w.
            a = cg * cg                                  # (Cp, Cp)
            v = jnp.sum(a * w, axis=1, keepdims=True)    # (Cp, 1): sum_j cg_ij^2 w_j
            total = lax.dot_general(
                w, v,
                dimension_numbers=(((1,), (0,)), ((), ())),
                preferred_element_type=jnp.float32,
                precision=lax.Precision.HIGHEST)         # (1, 1)

            # diagonal contribution corr_ii^2 from the 1-D diag vector.
            diag_sq = jnp.sum((diag_cg * w) ** 2, axis=1, keepdims=True)  # (1, 1)

            out_ref[...] = (total - diag_sq) * jnp.float32(final_scale)

    return kernel


def feddecorr_loss(x, *, use_bf16_matmul=True, tile_n=None):
    """FedDecorrLoss.forward(x) for x of shape (N, C). Returns scalar f32.

    use_bf16_matmul: cast the Gram-matmul operands to bf16 (f32 accumulation).
      ~3-6x MXU throughput; the accuracy impact on this decorrelation loss is
      negligible. Set False for near-bit-faithful f32 math.
    """
    n, c = x.shape
    if n == 1:
        # The PyTorch module returns the Python float 0.0 in this case.
        return jnp.float32(0.0)

    cp = _round_up(c, _LANE)                             # lane-aligned feature dim

    # VMEM budgeting (conservative enough for v7x's 64 MiB physical VMEM):
    # G accumulator + S/Q vectors + 2x (double-buffered) input tiles.
    acc_bytes = cp * cp * 4 + 2 * _SUBLANE * cp * 4
    in_item = x.dtype.itemsize
    budget = 40 * 1024 * 1024
    if tile_n is None:
        tile_n = 512
        while tile_n > _SUBLANE and 2 * tile_n * cp * in_item + acc_bytes > budget:
            tile_n //= 2
    tile_n = max(_SUBLANE, _round_up(min(tile_n, _round_up(n, _SUBLANE)), _SUBLANE))
    np_rows = _round_up(n, tile_n)
    # NOTE: for very large C (C*C*4 bytes approaching VMEM) the Gram accumulator
    # should additionally be tiled over columns (which would also give a
    # "parallel" axis for v7x's two TensorCores); unnecessary for typical C.

    # Zero-padding rows/columns is exact: padded entries contribute 0 to G/S/Q
    # (hence 0 to every corr entry); the true N and C are baked into finalize.
    x_p = jnp.pad(x, ((0, np_rows - n), (0, cp - c)))

    if use_bf16_matmul:
        mm_dtype, mm_precision = jnp.bfloat16, None
    else:
        mm_dtype, mm_precision = jnp.float32, lax.Precision.HIGHEST

    est_bytes = 2 * tile_n * cp * in_item + acc_bytes + (1 << 20)
    vmem_limit = int(max(16 << 20, min(est_bytes + (8 << 20), 64 << 20)))

    kernel = _make_kernel(n, c, mm_dtype, mm_precision)
    out = pl.pallas_call(
        kernel,
        out_shape=jax.ShapeDtypeStruct((1, 1), jnp.float32),
        grid_spec=pltpu.PrefetchScalarGridSpec(
            num_scalar_prefetch=0,
            grid=(np_rows // tile_n,),
            in_specs=[pl.BlockSpec((tile_n, cp), lambda i: (i, 0))],
            out_specs=pl.BlockSpec((1, 1), lambda i: (0, 0)),
            scratch_shapes=[
                pltpu.VMEM((cp, cp), jnp.float32),       # G accumulator
                pltpu.VMEM((1, cp), jnp.float32),        # S: column sums
                pltpu.VMEM((1, cp), jnp.float32),        # Q: column sums of squares
            ],
        ),
        compiler_params=pltpu.CompilerParams(
            dimension_semantics=("arbitrary",),
            vmem_limit_bytes=vmem_limit,
        ),
    )(x_p)
    return out[0, 0]


def _reference(x):
    """Pure-JAX replica of the PyTorch forward, for correctness checking."""
    x = x.astype(jnp.float32)
    n, c = x.shape
    if n == 1:
        return jnp.float32(0.0)
    x = x - jnp.mean(x, axis=0, keepdims=True)
    var = jnp.sum(x * x, axis=0, keepdims=True) / (n - 1)   # unbiased var
    x = x / jnp.sqrt(_EPS + var)
    corr = jnp.matmul(x.T, x, precision=lax.Precision.HIGHEST)
    mask = ~jnp.eye(c, dtype=bool)
    off = jnp.where(mask, corr, 0.0)
    return jnp.sum(off * off) / (c * c - c) / n


if __name__ == "__main__":
    key = jax.random.PRNGKey(0)
    k1, k2 = jax.random.split(key)

    # Case 1: small, lane-unaligned feature dim (exercises C padding), one tile.
    x1 = jax.random.normal(k1, (8, 32), dtype=jnp.float32)
    ref1 = _reference(x1)

    out1_f32 = jax.block_until_ready(feddecorr_loss(x1, use_bf16_matmul=False))
    assert jnp.allclose(out1_f32, ref1, rtol=1e-4, atol=1e-6), (out1_f32, ref1)

    out1_bf16 = jax.block_until_ready(feddecorr_loss(x1, use_bf16_matmul=True))
    assert jnp.allclose(out1_bf16, ref1, rtol=3e-2, atol=1e-4), (out1_bf16, ref1)

    # Case 2: multi-tile reduction over N with both row and column padding.
    x2 = jax.random.normal(k2, (40, 48), dtype=jnp.float32) + 0.5
    ref2 = _reference(x2)
    out2 = jax.block_until_ready(
        feddecorr_loss(x2, use_bf16_matmul=False, tile_n=16))
    assert jnp.allclose(out2, ref2, rtol=1e-4, atol=1e-6), (out2, ref2)

    # N == 1 early-exit path (the PyTorch module returns 0.0).
    x3 = jax.random.normal(k1, (1, 32), dtype=jnp.float32)
    assert float(feddecorr_loss(x3)) == 0.0

    print("KERNEL_OK")
</pallas_src>

<mosaic_0001>
module attributes {stable_mosaic.version = 11 : i64} {
  func.func @kernel(%arg0: i32, %arg1: memref<8x128xf32, #tpu.memory_space<vmem>>, %arg2: memref<1x1xf32, #tpu.memory_space<vmem>>, %arg3: memref<128x128xf32, #tpu.memory_space<vmem>>, %arg4: memref<1x128xf32, #tpu.memory_space<vmem>>, %arg5: memref<1x128xf32, #tpu.memory_space<vmem>>) attributes {dimension_semantics = [#tpu.dimension_semantics<arbitrary>], iteration_bounds = array<i64: 1>, scalar_prefetch = 0 : i64, scratch_operands = 3 : i64, tpu.core_type = #tpu.core_type<tc>, window_params = [{transform_indices = @transform_0, window_bounds = array<i64: 8, 128>}, {pipeline_mode = #tpu.pipeline_mode<synchronous>, transform_indices = @transform_1, window_bounds = array<i64: 1, 1>}]} {
    %c0_i32 = arith.constant 0 : i32
    %0 = arith.cmpi eq, %arg0, %c0_i32 : i32
    %1 = arith.extui %0 : i1 to i32
    %c0_i32_0 = arith.constant 0 : i32
    %2 = arith.cmpi ne, %1, %c0_i32_0 : i32
    scf.if %2 {
      %cst_18 = arith.constant 0.000000e+00 : f32
      %22 = vector.broadcast %cst_18 : f32 to vector<128x128xf32>
      %c0_19 = arith.constant 0 : index
      %c0_20 = arith.constant 0 : index
      %23 = vector.load %arg3[%c0_19, %c0_20] : memref<128x128xf32, #tpu.memory_space<vmem>>, vector<128x128xf32>
      tpu.vector_store %arg3[%c0_19, %c0_20], %22 {strides = array<i32>} : memref<128x128xf32, #tpu.memory_space<vmem>>, vector<128x128xf32>,
      %cst_21 = arith.constant 0.000000e+00 : f32
      %24 = vector.broadcast %cst_21 : f32 to vector<1x128xf32>
      %c0_22 = arith.constant 0 : index
      %c0_23 = arith.constant 0 : index
      %25 = vector.load %arg4[%c0_22, %c0_23] : memref<1x128xf32, #tpu.memory_space<vmem>>, vector<1x128xf32>
      tpu.vector_store %arg4[%c0_22, %c0_23], %24 {strides = array<i32>} : memref<1x128xf32, #tpu.memory_space<vmem>>, vector<1x128xf32>,
      %cst_24 = arith.constant 0.000000e+00 : f32
      %26 = vector.broadcast %cst_24 : f32 to vector<1x128xf32>
      %c0_25 = arith.constant 0 : index
      %c0_26 = arith.constant 0 : index
      %27 = vector.load %arg5[%c0_25, %c0_26] : memref<1x128xf32, #tpu.memory_space<vmem>>, vector<1x128xf32>
      tpu.vector_store %arg5[%c0_25, %c0_26], %26 {strides = array<i32>} : memref<1x128xf32, #tpu.memory_space<vmem>>, vector<1x128xf32>,
    } else {
    }
    %c0 = arith.constant 0 : index
    %c0_1 = arith.constant 0 : index
    %3 = vector.load %arg1[%c0, %c0_1] : memref<8x128xf32, #tpu.memory_space<vmem>>, vector<8x128xf32>
    %c0_2 = arith.constant 0 : index
    %c0_3 = arith.constant 0 : index
    %4 = vector.load %arg3[%c0_2, %c0_3] : memref<128x128xf32, #tpu.memory_space<vmem>>, vector<128x128xf32>
    %cst = arith.constant dense<0.000000e+00> : vector<128x128xf32>
    %5 = tpu.matmul %3, %3, %cst {dimension_numbers = #tpu.dot_dimension_numbers<[0], [0], [1], [1], [0, 1, 1, 1], [], []>, precision = #tpu.contract_precision<fp32>} : vector<8x128xf32>, vector<8x128xf32>, vector<128x128xf32> -> vector<128x128xf32>
    %6 = arith.addf %4, %5 : vector<128x128xf32>
    %c0_4 = arith.constant 0 : index
    %c0_5 = arith.constant 0 : index
    %7 = vector.load %arg3[%c0_4, %c0_5] : memref<128x128xf32, #tpu.memory_space<vmem>>, vector<128x128xf32>
    tpu.vector_store %arg3[%c0_4, %c0_5], %6 {strides = array<i32>} : memref<128x128xf32, #tpu.memory_space<vmem>>, vector<128x128xf32>,
    %c0_6 = arith.constant 0 : index
    %c0_7 = arith.constant 0 : index
    %8 = vector.load %arg4[%c0_6, %c0_7] : memref<1x128xf32, #tpu.memory_space<vmem>>, vector<1x128xf32>
    %cst_8 = arith.constant dense<0.000000e+00> : vector<128xf32>
    %9 = vector.multi_reduction <add>, %3, %cst_8 [0] : vector<8x128xf32> to vector<128xf32>
    %10 = vector.shape_cast %9 : vector<128xf32> to vector<1x128xf32>
    %11 = arith.addf %8, %10 : vector<1x128xf32>
    %c0_9 = arith.constant 0 : index
    %c0_10 = arith.constant 0 : index
    %12 = vector.load %arg4[%c0_9, %c0_10] : memref<1x128xf32, #tpu.memory_space<vmem>>, vector<1x128xf32>
    tpu.vector_store %arg4[%c0_9, %c0_10], %11 {strides = array<i32>} : memref<1x128xf32, #tpu.memory_space<vmem>>, vector<1x128xf32>,
    %c0_11 = arith.constant 0 : index
    %c0_12 = arith.constant 0 : index
    %13 = vector.load %arg5[%c0_11, %c0_12] : memref<1x128xf32, #tpu.memory_space<vmem>>, vector<1x128xf32>
    %14 = arith.mulf %3, %3 : vector<8x128xf32>
    %cst_13 = arith.constant dense<0.000000e+00> : vector<128xf32>
    %15 = vector.multi_reduction <add>, %14, %cst_13 [0] : vector<8x128xf32> to vector<128xf32>
    %16 = vector.shape_cast %15 : vector<128xf32> to vector<1x128xf32>
    %17 = arith.addf %13, %16 : vector<1x128xf32>
    %c0_14 = arith.constant 0 : index
    %c0_15 = arith.constant 0 : index
    %18 = vector.load %arg5[%c0_14, %c0_15] : memref<1x128xf32, #tpu.memory_space<vmem>>, vector<1x128xf32>
    tpu.vector_store %arg5[%c0_14, %c0_15], %17 {strides = array<i32>} : memref<1x128xf32, #tpu.memory_space<vmem>>, vector<1x128xf32>,
    %c0_i32_16 = arith.constant 0 : i32
    %19 = arith.cmpi eq, %arg0, %c0_i32_16 : i32
    %20 = arith.extui %19 : i1 to i32
    %c0_i32_17 = arith.constant 0 : i32
    %21 = arith.cmpi ne, %20, %c0_i32_17 : i32
    scf.if %21 {
      %c0_18 = arith.constant 0 : index
      %c0_19 = arith.constant 0 : index
      %22 = vector.load %arg3[%c0_18, %c0_19] : memref<128x128xf32, #tpu.memory_space<vmem>>, vector<128x128xf32>
      %c0_20 = arith.constant 0 : index
      %c0_21 = arith.constant 0 : index
      %23 = vector.load %arg4[%c0_20, %c0_21] : memref<1x128xf32, #tpu.memory_space<vmem>>, vector<1x128xf32>
      %c0_22 = arith.constant 0 : index
      %c0_23 = arith.constant 0 : index
      %24 = vector.load %arg5[%c0_22, %c0_23] : memref<1x128xf32, #tpu.memory_space<vmem>>, vector<1x128xf32>
      %cst_24 = arith.constant dense<0.000000e+00> : vector<128x128xf32>
      %25 = tpu.matmul %23, %23, %cst_24 {dimension_numbers = #tpu.dot_dimension_numbers<[0], [0], [1], [1], [0, 1, 1, 1], [], []>, precision = #tpu.contract_precision<fp32>} : vector<1x128xf32>, vector<1x128xf32>, vector<128x128xf32> -> vector<128x128xf32>
      %cst_25 = arith.constant 1.250000e-01 : f32
      %26 = vector.broadcast %cst_25 : f32 to vector<128x128xf32>
      %27 = arith.mulf %25, %26 : vector<128x128xf32>
      %28 = arith.subf %22, %27 : vector<128x128xf32>
      %29 = arith.mulf %23, %23 : vector<1x128xf32>
      %cst_26 = arith.constant 1.250000e-01 : f32
      %30 = vector.broadcast %cst_26 : f32 to vector<1x128xf32>
      %31 = arith.mulf %29, %30 : vector<1x128xf32>
      %32 = arith.subf %24, %31 : vector<1x128xf32>
      %cst_27 = arith.constant 0.142857149 : f32
      %33 = vector.broadcast %cst_27 : f32 to vector<1x128xf32>
      %34 = arith.mulf %32, %33 : vector<1x128xf32>
      %cst_28 = arith.constant 9.99999993E-9 : f32
      %35 = vector.broadcast %cst_28 : f32 to vector<1x128xf32>
      %36 = arith.addf %35, %34 : vector<1x128xf32>
      %cst_29 = arith.constant 1.000000e+00 : f32
      %37 = vector.broadcast %cst_29 : f32 to vector<1x128xf32>
      %38 = arith.divf %37, %36 : vector<1x128xf32>
      %39 = arith.mulf %28, %28 : vector<128x128xf32>
      %40 = vector.broadcast %38 : vector<1x128xf32> to vector<128x128xf32>
      %41 = arith.mulf %39, %40 : vector<128x128xf32>
      %cst_30 = arith.constant dense<0.000000e+00> : vector<128xf32>
      %42 = vector.multi_reduction <add>, %41, %cst_30 [1] : vector<128x128xf32> to vector<128xf32>
      %43 = vector.shape_cast %42 : vector<128xf32> to vector<128x1xf32>
      %cst_31 = arith.constant dense<0.000000e+00> : vector<1x1xf32>
      %44 = tpu.matmul %38, %43, %cst_31 {dimension_numbers = #tpu.dot_dimension_numbers<[1], [0], [0], [1], [0, 0, 1, 1], [], []>, precision = #tpu.contract_precision<fp32>} : vector<1x128xf32>, vector<128x1xf32>, vector<1x1xf32> -> vector<1x1xf32>
      %45 = arith.mulf %32, %38 : vector<1x128xf32>
      %46 = arith.mulf %45, %45 : vector<1x128xf32>
      %cst_32 = arith.constant dense<0.000000e+00> : vector<1xf32>
      %47 = vector.multi_reduction <add>, %46, %cst_32 [1] : vector<1x128xf32> to vector<1xf32>
      %48 = vector.shape_cast %47 : vector<1xf32> to vector<1x1xf32>
      %49 = arith.subf %44, %48 : vector<1x1xf32>
      %cst_33 = arith.constant 1.26008061E-4 : f32
      %50 = vector.broadcast %cst_33 : f32 to vector<1x1xf32>
      %51 = arith.mulf %49, %50 : vector<1x1xf32>
      %c0_34 = arith.constant 0 : index
      %c0_35 = arith.constant 0 : index
      %52 = vector.load %arg2[%c0_34, %c0_35] : memref<1x1xf32, #tpu.memory_space<vmem>>, vector<1x1xf32>
      tpu.vector_store %arg2[%c0_34, %c0_35], %51 {strides = array<i32>} : memref<1x1xf32, #tpu.memory_space<vmem>>, vector<1x1xf32>,
    } else {
    }
    return
  }
  func.func @transform_0(%arg0: i32) -> (i32, i32) {
    %c0_i32 = arith.constant 0 : i32
    %c0_i32_0 = arith.constant 0 : i32
    return %arg0, %c0_i32 : i32, i32
  }
  func.func @transform_1(%arg0: i32) -> (i32, i32) {
    %c0_i32 = arith.constant 0 : i32
    %c0_i32_0 = arith.constant 0 : i32
    %c0_i32_1 = arith.constant 0 : i32
    return %c0_i32, %c0_i32_0 : i32, i32
  }
}

</mosaic_0001>

<bundles_post_ra>
// kernel: tpu_custom_call.1
= control target key start
LH: loop header
LB: loop body
LE: loop exit
PB: predicated region body
PF: predicated region fallthrough
CT: control target
= control target key end

     0   :  { %6 = vsyncpa [#allocation6], 0  ;;  %s5270_s0 = inlined_call_operand.hbm [shape: f32[8,128], index: 0, kind: input, shape index: {}]   ;;  %s5271_s1 = inlined_call_operand.hbm [shape: f32[1,1], index: 1, kind: output, shape index: {}]  }
   0x1   :  { %7 = vsyncpa [#allocation7], 0  ;;  %s4133_s6 = smov [#allocation5]  }
   0x2   :  { %s14_s7 = sshll.u32 %s4133_s6, 4  ;;  %s15_s7 = int_to_ptr.vmem [resolvable:$true] %s14_s7 }
   0x3   :  { %s4097_s8 = scalar_lea.vmem %s15_s7, 128  ;;  %p4102_p1 = scmp.lt.s32.totalorder %s15_s7, %s15_s7 }
   0x4   :  { %p4098_p0 = scmp.ne.s32.totalorder %s15_s7, %s4097_s8  ;;  %p4103_p2 = scmp.lt.s32.totalorder %s4097_s8, %s4097_s8 }
   0x6   :  { %p4104_p3 = por %p4103_p2, %p4102_p1 }
   0x8   :  { %p4105_p4 = pnand %p4104_p3, %p4098_p0 }
   0xa   :  { %4108 = shalt.err (!%p4105_p4)
}
   0xb   :  { %17 = dma.hbm_to_vmem [thread:$0]  %s5270_s0, 128, %s15_s7, [#allocation6]  }
   0xc   :  { %4129 = dma.done.wait [#allocation6], 128  }
   0xd   :  { %4130 = vsyncadd [#allocation6], 4294967168  ;;  %v5272_v0 = vmov 0.0   ;;  %v43_v1 = vld [vmem:[#allocation5] sm:$0xff]  ;;  %vm92_vm0 = vcmask 64512   ;;  %vm1385_vm1 = vcmask 1040384  }
   0xe   :  { %41 = vst [vmem:[#allocation3] sm:$0x1] %v5272_v0  ;;  %42 = vst [vmem:[#allocation4] sm:$0x1] %v5272_v0  ;;  %60 = vxpose.xlu0.b32.start.end [1/1] (short) %v43_v1, 128  ;;  %v4152_v2 = vand.u32 4294901760, %v43_v1  ;;  %v1265_v3 = vrot.slane %v43_v1, 4  ;;  %v1274_v4 = vmul.f32 %v43_v1, %v43_v1 }
   0xf   :  { %vm1336_vm2 = vcmask 7168   ;;  %vm4135_vm3 = vmmov 0   ;;  %s4136_s0 = smov [#allocation8]   ;;  %vm3237_vm4 = vcmask 0  }
  0x10   :  { %v1266_v5 = vadd.f32 %v1265_v3, %v43_v1  ;;  %v1275_v6 = vrot.slane %v1274_v4, 4  ;;  %v399_v7 = vsub.f32 %v43_v1, %v4152_v2  ;;  %3560 = vmatprep.subr.mxu0 %v4152_v2  ;;  %s3245_s11 = sshll.u32 %s4136_s0, 4  ;;  %s3246_s11 = int_to_ptr.vmem [resolvable:$true] %s3245_s11 }
  0x11   :  { %3561 = vmatpush3.msra.mxu0 %v4152_v2  ;;  %s4109_s12 = scalar_lea.vmem %s3246_s11, 16  ;;  %s4113_s13 = scalar_lea.vmem %s3246_s11, 32 }
  0x12   :  { %v1267_v8 = vrot.slane %v1266_v5, 2  ;;  %v1276_v9 = vadd.f32 %v1275_v6, %v1274_v4  ;;  %v4157_v10 = vand.u32 4294901760, %v399_v7  ;;  %3612 = vmatprep.subr.mxu0 %v399_v7  ;;  %p4110_p5 = scmp.ne.s32.totalorder %s3246_s11, %s4109_s12  ;;  %p4114_p6 = scmp.lt.s32.totalorder %s3246_s11, %s3246_s11 }
  0x13   :  { %p4115_p7 = scmp.lt.s32.totalorder %s4113_s13, %s4109_s12 }
  0x14   :  { %v1268_v11 = vadd.f32 %v1267_v8, %v1266_v5  ;;  %v1277_v12 = vrot.slane %v1276_v9, 2  ;;  %v401_v13 = vsub.f32 %v399_v7, %v4157_v10 }
  0x15   :  { %v1264_v17 = vld [vmem:[#allocation3] sm:$0x1]  ;;  %v1273_v20 = vld [vmem:[#allocation4] sm:$0x1]  ;;  %p4116_p8 = por %p4115_p7, %p4114_p6 }
  0x16   :  { %v1269_v14 = vrot.slane %v1268_v11, 1  ;;  %v1278_v15 = vadd.f32 %v1277_v12, %v1276_v9  ;;  %v402_v16 = vand.u32 4294901760, %v401_v13 }
  0x17   :  { %p4117_p9 = pnand %p4116_p8, %p4110_p5 }
  0x18   :  { %v1270_v18 = vadd.f32 %v1269_v14, %v1268_v11  ;;  %v1279_v19 = vrot.slane %v1278_v15, 1  ;;  %3586 = vmatprep.subr.mxu1 %v402_v16 }
  0x19   :  { %3587 = vmatpush3.msra.mxu1 %v402_v16 }
  0x1a   :  { %v1271_v21 = vadd.f32 %v1270_v18, %v1264_v17  ;;  %v1280_v22 = vadd.f32 %v1279_v19, %v1278_v15  ;;  %3638 = vmatprep.subr.mxu1 %v4152_v2 }
  0x1c   :  { %1272 = vst [vmem:[#allocation3] sm:$0x1] %v1271_v21  ;;  %v1281_v23 = vadd.f32 %v1280_v22, %v1273_v20 }
  0x1e   :  { %1282 = vst [vmem:[#allocation4] sm:$0x1] %v1281_v23 }
  0x23   :  { %v4161_v24 = vld [vmem:[#allocation3] sm:$0x1] }
  0x4b   :  { %1304 = vxpose.xlu0.b32.start.end [1/1] (short) %v4161_v24, 128 }
  0x8a   :  { %v76_v25 = vpop.trf.xlu0 }
  0x8b   :  { %v94_v26 = vsel %vm92_vm0, %v76_v25, 0 }
  0x8c   :  { %v4165_v27 = vand.u32 4294901760, %v94_v26 }
  0x8e   :  { %v4168_v28 = vsub.f32 %v94_v26, %v4165_v27  ;;  %3588 = vmatprep.mubr.f32.mxu1 %v4165_v27  ;;  %v77_v29 = vpop.trf.xlu0 }
  0x8f   :  { %v97_v30 = vsel %vm92_vm0, %v77_v29, 0 }
  0x90   :  { %v4172_v31 = vand.u32 4294901760, %v97_v30  ;;  %v209_v32 = vand.u32 4294901760, %v4168_v28 }
  0x92   :  { %v4176_v33 = vsub.f32 %v97_v30, %v4172_v31  ;;  %v78_v34 = vpop.trf.xlu0  ;;  %3589 = vmatmul.mubr.f32.vlgmr.msra.gmra.mxu1 %v4172_v31  ;;  %v210_v35 = vsub.f32 %v4168_v28, %v209_v32 }
  0x93   :  { %v100_v36 = vsel %vm92_vm0, %v78_v34, 0  ;;  %3639 = vmatpush3.msra.mxu1 %v4152_v2 }
  0x94   :  { %v219_v37 = vand.u32 4294901760, %v4176_v33  ;;  %v4185_v38 = vand.u32 4294901760, %v100_v36  ;;  %v211_v39 = vand.u32 4294901760, %v210_v35  ;;  %3690 = vmatprep.subr.mxu1 %v4152_v2 }
  0x96   :  { %v4189_v40 = vsub.f32 %v100_v36, %v4185_v38  ;;  %3562 = vmatprep.mubr.f32.mxu0 %v211_v39  ;;  %v79_v41 = vpop.trf.xlu0  ;;  %3591 = vmatprep.mubr.f32.mxu1 %v4185_v38  ;;  %v220_v42 = vsub.f32 %v4176_v33, %v219_v37 }
  0x97   :  { %v103_v43 = vsel %vm92_vm0, %v79_v41, 0 }
  0x98   :  { %v229_v44 = vand.u32 4294901760, %v4189_v40  ;;  %v4197_v45 = vand.u32 4294901760, %v103_v43  ;;  %v221_v46 = vand.u32 4294901760, %v220_v42 }
  0x9a   :  { %v4200_v47 = vsub.f32 %v103_v43, %v4197_v45  ;;  %v80_v48 = vpop.trf.xlu0  ;;  %3563 = vmatmul.mubr.f32.vlgmr.msra.gmra.mxu0 %v221_v46  ;;  %3592 = vmatmul.mubr.f32.gmra.mxu1 %v4197_v45  ;;  %v230_v49 = vsub.f32 %v4189_v40, %v229_v44 }
  0x9b   :  { %v106_v50 = vsel %vm92_vm0, %v80_v48, 0  ;;  %3613 = vmatpush3.msra.mxu0 %v399_v7 }
  0x9c   :  { %v239_v51 = vand.u32 4294901760, %v4200_v47  ;;  %v4208_v52 = vand.u32 4294901760, %v106_v50  ;;  %v231_v53 = vand.u32 4294901760, %v230_v49  ;;  %3664 = vmatprep.subr.mxu0 %v4157_v10 }
  0x9e   :  { %v4212_v54 = vsub.f32 %v106_v50, %v4208_v52  ;;  %v81_v55 = vpop.trf.xlu0  ;;  %3565 = vmatprep.mubr.f32.mxu0 %v231_v53  ;;  %3594 = vmatprep.mubr.f32.mxu1 %v4208_v52  ;;  %v240_v56 = vsub.f32 %v4200_v47, %v239_v51 }
  0x9f   :  { %v109_v57 = vsel %vm92_vm0, %v81_v55, 0 }
  0xa0   :  { %v249_v58 = vand.u32 4294901760, %v4212_v54  ;;  %v4220_v59 = vand.u32 4294901760, %v109_v57  ;;  %v241_v60 = vand.u32 4294901760, %v240_v56 }
  0xa2   :  { %v4223_v61 = vsub.f32 %v109_v57, %v4220_v59  ;;  %v82_v62 = vpop.trf.xlu0  ;;  %3566 = vmatmul.mubr.f32.gmra.mxu0 %v241_v60  ;;  %3595 = vmatmul.mubr.f32.gmra.mxu1 %v4220_v59  ;;  %v250_v63 = vsub.f32 %v4212_v54, %v249_v58  ;;  %v1387_v57 = vsel %vm1385_vm1, %v4161_v24, 0 }
  0xa3   :  { %v112_v1 = vsel %vm92_vm0, %v82_v62, 0 }
  0xa4   :  { %v259_v3 = vand.u32 4294901760, %v4223_v61  ;;  %v4231_v4 = vand.u32 4294901760, %v112_v1  ;;  %v251_v5 = vand.u32 4294901760, %v250_v63 }
  0xa6   :  { %v4234_v6 = vsub.f32 %v112_v1, %v4231_v4  ;;  %v83_v7 = vpop.trf.xlu0  ;;  %3568 = vmatprep.mubr.f32.mxu0 %v251_v5  ;;  %3597 = vmatprep.mubr.f32.mxu1 %v4231_v4  ;;  %v260_v8 = vsub.f32 %v4223_v61, %v259_v3  ;;  %v4298_v5 = vand.u32 4294901760, %v1387_v57 }
  0xa7   :  { %v115_v9 = vsel %vm92_vm0, %v83_v7, 0 }
  0xa8   :  { %v269_v11 = vand.u32 4294901760, %v4234_v6  ;;  %v4242_v12 = vand.u32 4294901760, %v115_v9  ;;  %v261_v13 = vand.u32 4294901760, %v260_v8 }
  0xaa   :  { %v4245_v14 = vsub.f32 %v115_v9, %v4242_v12  ;;  %v84_v15 = vpop.trf.xlu0  ;;  %3569 = vmatmul.mubr.f32.gmra.mxu0 %v261_v13  ;;  %3598 = vmatmul.mubr.f32.gmra.mxu1 %v4242_v12  ;;  %v270_v16 = vsub.f32 %v4234_v6, %v269_v11 }
  0xab   :  { %v118_v17 = vsel %vm92_vm0, %v84_v15, 0 }
  0xac   :  { %v279_v18 = vand.u32 4294901760, %v4245_v14  ;;  %v4253_v19 = vand.u32 4294901760, %v118_v17  ;;  %v271_v20 = vand.u32 4294901760, %v270_v16 }
  0xae   :  { %v4256_v21 = vsub.f32 %v118_v17, %v4253_v19  ;;  %v85_v22 = vpop.trf.xlu0  ;;  %3571 = vmatprep.mubr.f32.mxu0 %v271_v20  ;;  %3600 = vmatprep.mubr.f32.mxu1 %v4253_v19  ;;  %v280_v23 = vsub.f32 %v4245_v14, %v279_v18  ;;  %v4312_v17 = vsub.f32 %v1387_v57, %v4298_v5 }
  0xaf   :  { %v121_v25 = vsel %vm92_vm0, %v85_v22, 0 }
  0xb0   :  { %v289_v26 = vand.u32 4294901760, %v4256_v21  ;;  %v4264_v29 = vand.u32 4294901760, %v121_v25  ;;  %v281_v30 = vand.u32 4294901760, %v280_v23 }
  0xb2   :  { %v4267_v34 = vsub.f32 %v121_v25, %v4264_v29  ;;  %v86_v35 = vpop.trf.xlu0  ;;  %3572 = vmatmul.mubr.f32.gmra.mxu0 %v281_v30  ;;  %3601 = vmatmul.mubr.f32.gmra.mxu1 %v4264_v29  ;;  %v290_v36 = vsub.f32 %v4256_v21, %v289_v26 }
  0xb3   :  { %v124_v39 = vsel %vm92_vm0, %v86_v35, 0 }
  0xb4   :  { %v299_v41 = vand.u32 4294901760, %v4267_v34  ;;  %v4275_v42 = vand.u32 4294901760, %v124_v39  ;;  %v291_v43 = vand.u32 4294901760, %v290_v36 }
  0xb6   :  { %v4278_v46 = vsub.f32 %v124_v39, %v4275_v42  ;;  %v87_v48 = vpop.trf.xlu0  ;;  %3574 = vmatprep.mubr.f32.mxu0 %v291_v43  ;;  %3603 = vmatprep.mubr.f32.mxu1 %v4275_v42  ;;  %v300_v49 = vsub.f32 %v4267_v34, %v299_v41 }
  0xb7   :  { %v127_v50 = vsel %vm92_vm0, %v87_v48, 0 }
  0xb8   :  { %v309_v53 = vand.u32 4294901760, %v4278_v46  ;;  %v4286_v55 = vand.u32 4294901760, %v127_v50  ;;  %v301_v56 = vand.u32 4294901760, %v300_v49  ;;  %v4329_v49 = vand.u32 4294901760, %v4312_v17 }
  0xba   :  { %v4291_v60 = vsub.f32 %v127_v50, %v4286_v55  ;;  %v88_v62 = vpop.trf.xlu0  ;;  %3575 = vmatmul.mubr.f32.gmra.mxu0 %v301_v56  ;;  %3604 = vmatmul.mubr.f32.gmra.mxu1 %v4286_v55  ;;  %v310_v63 = vsub.f32 %v4278_v46, %v309_v53 }
  0xbb   :  { %v130_v1 = vsel %vm92_vm0, %v88_v62, 0 }
  0xbc   :  { %v319_v7 = vand.u32 4294901760, %v4291_v60  ;;  %v4301_v8 = vand.u32 4294901760, %v130_v1  ;;  %v311_v24 = vand.u32 4294901760, %v310_v63 }
  0xbe   :  { %v4304_v9 = vsub.f32 %v130_v1, %v4301_v8  ;;  %v89_v13 = vpop.trf.xlu0  ;;  %3577 = vmatprep.mubr.f32.mxu0 %v311_v24  ;;  %3606 = vmatprep.mubr.f32.mxu1 %v4301_v8  ;;  %v320_v15 = vsub.f32 %v4291_v60, %v319_v7 }
  0xbf   :  { %v133_v16 = vsel %vm92_vm0, %v89_v13, 0  ;;  %v1649_v13 = vsub.f32 %v4312_v17, %v4329_v49 }
  0xc0   :  { %v329_v20 = vand.u32 4294901760, %v4304_v9  ;;  %v4315_v22 = vand.u32 4294901760, %v133_v16  ;;  %v321_v23 = vand.u32 4294901760, %v320_v15 }
  0xc2   :  { %v4318_v25 = vsub.f32 %v133_v16, %v4315_v22  ;;  %v90_v30 = vpop.trf.xlu0  ;;  %3578 = vmatmul.mubr.f32.gmra.mxu0 %v321_v23  ;;  %3607 = vmatmul.mubr.f32.gmra.mxu1 %v4315_v22  ;;  %v330_v35 = vsub.f32 %v4304_v9, %v329_v20 }
  0xc3   :  { %v136_v36 = vsel %vm92_vm0, %v90_v30, 0 }
  0xc4   :  { %v339_v39 = vand.u32 4294901760, %v4318_v25  ;;  %v4326_v43 = vand.u32 4294901760, %v136_v36  ;;  %v331_v48 = vand.u32 4294901760, %v330_v35 }
  0xc6   :  { %v4332_v50 = vsub.f32 %v136_v36, %v4326_v43  ;;  %v91_v56 = vpop.trf.xlu0  ;;  %3580 = vmatprep.mubr.f32.mxu0 %v331_v48  ;;  %3609 = vmatprep.mubr.f32.mxu1 %v4326_v43  ;;  %v340_v57 = vsub.f32 %v4318_v25, %v339_v39  ;;  %v1650_v36 = vand.u32 4294901760, %v1649_v13 }
  0xc7   :  { %v139_v62 = vsel %vm92_vm0, %v91_v56, 0 }
  0xc8   :  { %v349_v63 = vand.u32 4294901760, %v4332_v50  ;;  %v4338_v1 = vand.u32 4294901760, %v139_v62  ;;  %v341_v24 = vand.u32 4294901760, %v340_v57 }
  0xca   :  { %v358_v15 = vsub.f32 %v139_v62, %v4338_v1  ;;  %3581 = vmatmul.mubr.f32.gmra.mxu0 %v341_v24  ;;  %3610 = vmatmul.mubr.f32.gmra.mxu1 %v4338_v1  ;;  %v350_v16 = vsub.f32 %v4332_v50, %v349_v63  ;;  %v4345_v23 = vpop.trf.xlu0 }
  0xcb   :  { %3640 = vmatprep.mubr.f32.mxu1 %v209_v32 }
  0xcc   :  { %v359_v30 = vand.u32 4294901760, %v358_v15  ;;  %v351_v35 = vand.u32 4294901760, %v350_v16 }
  0xce   :  { %3583 = vmatprep.mubr.f32.mxu0 %v351_v35  ;;  %3641 = vmatmul.mubr.f32.vlgmr.msra.gmra.mxu1 %v219_v37  ;;  %v360_v48 = vsub.f32 %v358_v15, %v359_v30  ;;  %v4351_v56 = vpop.trf.xlu0 }
  0xcf   :  { %3643 = vmatprep.mubr.f32.mxu1 %v229_v44  ;;  %3691 = vmatpush3.msra.mxu1 %v4152_v2 }
  0xd0   :  { %v361_v57 = vand.u32 4294901760, %v360_v48  ;;  %3742 = vmatprep.subr.mxu1 %v1650_v36 }
  0xd2   :  { %3584 = vmatmul.mubr.f32.gmra.mxu0 %v361_v57  ;;  %3644 = vmatmul.mubr.f32.gmra.mxu1 %v239_v51  ;;  %v4358_v32 = vpop.trf.xlu0 }
  0xd3   :  { %3614 = vmatprep.mubr.f32.mxu0 %v4168_v28  ;;  %3646 = vmatprep.mubr.f32.mxu1 %v249_v58 }
  0xd6   :  { %3615 = vmatmul.mubr.f32.vlgmr.msra.gmra.mxu0 %v4176_v33  ;;  %3647 = vmatmul.mubr.f32.gmra.mxu1 %v259_v3  ;;  %v4366_v37 = vpop.trf.xlu0 }
  0xd7   :  { %3665 = vmatpush3.msra.mxu0 %v4157_v10  ;;  %3617 = vmatprep.mubr.f32.mxu0 %v4189_v40 }
  0xd8   :  { %3649 = vmatprep.mubr.f32.mxu1 %v269_v11  ;;  %3716 = vmatprep.subr.mxu0 %v4298_v5 }
  0xda   :  { %3618 = vmatmul.mubr.f32.gmra.mxu0 %v4200_v47  ;;  %3650 = vmatmul.mubr.f32.gmra.mxu1 %v279_v18  ;;  %v4376_v2 = vpop.trf.xlu0  ;;  %v1344_v47 = vsel %vm1336_vm2, %v4358_v32, 0 }
  0xdb   :  { %3620 = vmatprep.mubr.f32.mxu0 %v4212_v54  ;;  %3652 = vmatprep.mubr.f32.mxu1 %v289_v26  ;;  %v4445_v58 = vand.u32 4294901760, %v1344_v47 }
  0xdd   :  { %v4465_v18 = vsub.f32 %v1344_v47, %v4445_v58 }
  0xde   :  { %3621 = vmatmul.mubr.f32.gmra.mxu0 %v4223_v61  ;;  %3653 = vmatmul.mubr.f32.gmra.mxu1 %v299_v41  ;;  %v4384_v10 = vpop.trf.xlu0  ;;  %v1350_v61 = vsel %vm1336_vm2, %v4376_v2, 0 }
  0xdf   :  { %3623 = vmatprep.mubr.f32.mxu0 %v4234_v6  ;;  %3655 = vmatprep.mubr.f32.mxu1 %v309_v53  ;;  %v1353_v6 = vsel %vm1336_vm2, %v4384_v10, 0 }
  0xe2   :  { %3624 = vmatmul.mubr.f32.gmra.mxu0 %v4245_v14  ;;  %3656 = vmatmul.mubr.f32.gmra.mxu1 %v319_v7  ;;  %v1326_v28 = vpop.trf.xlu0 }
  0xe3   :  { %3626 = vmatprep.mubr.f32.mxu0 %v4256_v21  ;;  %3658 = vmatprep.mubr.f32.mxu1 %v329_v20  ;;  %v1356_v11 = vsel %vm1336_vm2, %v1326_v28, 0  ;;  %v4471_v21 = vand.u32 4294901760, %v1353_v6 }
  0xe4   :  { %v4473_v26 = vand.u32 4294901760, %v1356_v11 }
  0xe5   :  { %v4494_v7 = vsub.f32 %v1353_v6, %v4471_v21 }
  0xe6   :  { %3627 = vmatmul.mubr.f32.gmra.mxu0 %v4267_v34  ;;  %3659 = vmatmul.mubr.f32.gmra.mxu1 %v339_v39  ;;  %v4398_v33 = vpop.trf.xlu0 }
  0xe7   :  { %3629 = vmatprep.mubr.f32.mxu0 %v4278_v46  ;;  %3661 = vmatprep.mubr.f32.mxu1 %v349_v63  ;;  %v1359_v41 = vsel %vm1336_vm2, %v4398_v33, 0  ;;  %v1507_v24 = vand.u32 4294901760, %v4494_v7 }
  0xe9   :  { %v1508_v2 = vsub.f32 %v4494_v7, %v1507_v24 }
  0xea   :  { %3630 = vmatmul.mubr.f32.gmra.mxu0 %v4291_v60  ;;  %3662 = vmatmul.mubr.f32.gmra.mxu1 %v359_v30  ;;  %v1328_v40 = vpop.trf.xlu0 }
  0xeb   :  { %3632 = vmatprep.mubr.f32.mxu0 %v4304_v9  ;;  %3692 = vmatprep.mubr.f32.mxu1 %v4165_v27  ;;  %v1362_v53 = vsel %vm1336_vm2, %v1328_v40, 0  ;;  %v4499_v9 = vand.u32 4294901760, %v1359_v41 }
  0xee   :  { %3633 = vmatmul.mubr.f32.gmra.mxu0 %v4318_v25  ;;  %3693 = vmatmul.mubr.f32.vlgmr.msra.gmra.mxu1 %v4172_v31  ;;  %v4412_v44 = vpop.trf.xlu0  ;;  %v4507_v25 = vand.u32 4294901760, %v1362_v53 }
  0xef   :  { %3635 = vmatprep.mubr.f32.mxu0 %v4332_v50  ;;  %3695 = vmatprep.mubr.f32.mxu1 %v4185_v38  ;;  %v1365_v50 = vsel %vm1336_vm2, %v4412_v44, 0 }
  0xf0   :  { %3743 = vmatpush3.msra.mxu1 %v1650_v36  ;;  %v4529_v30 = vand.u32 4294901760, %v1365_v50 }
  0xf1   :  { %3794 = vmatprep.subr.mxu1 %v4298_v5 }
  0xf2   :  { %3636 = vmatmul.mubr.f32.gmra.mxu0 %v358_v15  ;;  %3696 = vmatmul.mubr.f32.gmra.mxu1 %v4197_v45  ;;  %v4523_v15 = vsub.f32 %v1359_v41, %v4499_v9  ;;  %v4553_v33 = vsub.f32 %v1365_v50, %v4529_v30 }
  0xf3   :  { %3666 = vmatprep.mubr.f32.mxu0 %v4165_v27  ;;  %3698 = vmatprep.mubr.f32.mxu1 %v4208_v52  ;;  %v1330_v27 = vpop.trf.xlu0 }
  0xf4   :  { %v1368_v63 = vsel %vm1336_vm2, %v1330_v27, 0 }
  0xf5   :  { %v4534_v36 = vand.u32 4294901760, %v1368_v63 }
  0xf6   :  { %3667 = vmatmul.mubr.f32.vlgmr.msra.gmra.mxu0 %v4172_v31  ;;  %3699 = vmatmul.mubr.f32.gmra.mxu1 %v4220_v59  ;;  %v1338_v31 = vsel %vm1336_vm2, %v4345_v23, 0  ;;  %v4527_v23 = vsub.f32 %v1362_v53, %v4507_v25 }
  0xf7   :  { %3717 = vmatpush3.msra.mxu0 %v4298_v5  ;;  %3669 = vmatprep.mubr.f32.mxu0 %v4185_v38  ;;  %v4428_v38 = vand.u32 4294901760, %v1338_v31  ;;  %v4436_v51 = vpop.trf.xlu0 }
  0xf8   :  { %3701 = vmatprep.mubr.f32.mxu1 %v4231_v4  ;;  %3768 = vmatprep.subr.mxu0 %v4312_v17  ;;  %v1371_v48 = vsel %vm1336_vm2, %v4436_v51, 0  ;;  %v1537_v28 = vand.u32 4294901760, %v4527_v23 }
  0xf9   :  { %v4443_v54 = vsub.f32 %v1338_v31, %v4428_v38  ;;  %v4555_v40 = vand.u32 4294901760, %v1371_v48 }
  0xfa   :  { %3670 = vmatmul.mubr.f32.gmra.mxu0 %v4197_v45  ;;  %3702 = vmatmul.mubr.f32.gmra.mxu1 %v4242_v12  ;;  %v1341_v45 = vsel %vm1336_vm2, %v4351_v56, 0  ;;  %v1538_v53 = vsub.f32 %v4527_v23, %v1537_v28 }
  0xfb   :  { %3672 = vmatprep.mubr.f32.mxu0 %v4208_v52  ;;  %3704 = vmatprep.mubr.f32.mxu1 %v4253_v19  ;;  %v4440_v52 = vand.u32 4294901760, %v1341_v45  ;;  %v1457_v14 = vand.u32 4294901760, %v4443_v54 }
  0xfd   :  { %v4456_v3 = vsub.f32 %v1341_v45, %v4440_v52 }
  0xfe   :  { %3673 = vmatmul.mubr.f32.gmra.mxu0 %v4220_v59  ;;  %3705 = vmatmul.mubr.f32.gmra.mxu1 %v4264_v29  ;;  %v1347_v59 = vsel %vm1336_vm2, %v4366_v37, 0  ;;  %v1527_v37 = vand.u32 4294901760, %v4523_v15 }
  0xff   :  { %3675 = vmatprep.mubr.f32.mxu0 %v4231_v4  ;;  %3707 = vmatprep.mubr.f32.mxu1 %v4275_v42  ;;  %v4458_v4 = vand.u32 4294901760, %v1347_v59 }
 0x100   :  { %v1528_v6 = vsub.f32 %v4523_v15, %v1527_v37 }
 0x101   :  { %v4479_v34 = vsub.f32 %v1347_v59, %v4458_v4  ;;  %v1509_v59 = vand.u32 4294901760, %v1508_v2 }
 0x102   :  { %3676 = vmatmul.mubr.f32.gmra.mxu0 %v4242_v12  ;;  %3708 = vmatmul.mubr.f32.gmra.mxu1 %v4286_v55  ;;  %v1332_v12 = vpop.trf.xlu0 }
 0x103   :  { %3678 = vmatprep.mubr.f32.mxu0 %v4253_v19  ;;  %3710 = vmatprep.mubr.f32.mxu1 %v4301_v8  ;;  %v4467_v19 = vand.u32 4294901760, %v1350_v61  ;;  %v1374_v32 = vsel %vm1336_vm2, %v1332_v12, 0  ;;  %v4573_v12 = vsub.f32 %v1371_v48, %v4555_v40 }
 0x104   :  { %v4562_v27 = vand.u32 4294901760, %v1374_v32 }
 0x105   :  { %v4485_v46 = vsub.f32 %v1350_v61, %v4467_v19 }
 0x106   :  { %3679 = vmatmul.mubr.f32.gmra.mxu0 %v4264_v29  ;;  %3711 = vmatmul.mubr.f32.gmra.mxu1 %v4315_v22  ;;  %v1467_v29 = vand.u32 4294901760, %v4456_v3  ;;  %v1333_v60 = vpop.trf.xlu0 }
 0x107   :  { %3681 = vmatprep.mubr.f32.mxu0 %v4275_v42  ;;  %3713 = vmatprep.mubr.f32.mxu1 %v4326_v43  ;;  %v1477_v42 = vand.u32 4294901760, %v4465_v18  ;;  %v1497_v39 = vand.u32 4294901760, %v4485_v46  ;;  %v1377_v31 = vsel %vm1336_vm2, %v1333_v60, 0  ;;  %v4582_v60 = vsub.f32 %v1374_v32, %v4562_v27 }
 0x108   :  { %v1468_v20 = vsub.f32 %v4456_v3, %v1467_v29  ;;  %v4575_v41 = vand.u32 4294901760, %v1377_v31 }
 0x109   :  { %v1498_v57 = vsub.f32 %v4485_v46, %v1497_v39 }
 0x10a   :  { %3682 = vmatmul.mubr.f32.gmra.mxu0 %v4286_v55  ;;  %3714 = vmatmul.mubr.f32.gmra.mxu1 %v4338_v1  ;;  %v1458_v55 = vsub.f32 %v4443_v54, %v1457_v14  ;;  %v1469_v16 = vand.u32 4294901760, %v1468_v20  ;;  %v1334_v35 = vpop.trf.xlu0 }
 0x10b   :  { %3684 = vmatprep.mubr.f32.mxu0 %v4301_v8  ;;  %3744 = vmatprep.mubr.f32.mxu1 %v4428_v38  ;;  %v4497_v8 = vsub.f32 %v1356_v11, %v4473_v26  ;;  %v1499_v45 = vand.u32 4294901760, %v1498_v57  ;;  %v1380_v47 = vsel %vm1336_vm2, %v1334_v35, 0  ;;  %v1547_v11 = vand.u32 4294901760, %v4553_v33 }
 0x10c   :  { %v1459_v62 = vand.u32 4294901760, %v1458_v55  ;;  %v4584_v20 = vand.u32 4294901760, %v1380_v47  ;;  %v1577_v35 = vand.u32 4294901760, %v4582_v60 }
 0x10d   :  { %v1517_v13 = vand.u32 4294901760, %v4497_v8 }
 0x10e   :  { %3685 = vmatmul.mubr.f32.gmra.mxu0 %v4315_v22  ;;  %3745 = vmatmul.mubr.f32.vlgmr.msra.gmra.mxu1 %v4440_v52  ;;  %v1487_v22 = vand.u32 4294901760, %v4479_v34  ;;  %v1335_v51 = vpop.trf.xlu0  ;;  %v4600_v48 = vsub.f32 %v1380_v47, %v4584_v20  ;;  %v1578_v47 = vsub.f32 %v4582_v60, %v1577_v35 }
 0x10f   :  { %3687 = vmatprep.mubr.f32.mxu0 %v4326_v43  ;;  %3747 = vmatprep.mubr.f32.mxu1 %v4445_v58  ;;  %v1478_v43 = vsub.f32 %v4465_v18, %v1477_v42  ;;  %v1518_v10 = vsub.f32 %v4497_v8, %v1517_v13  ;;  %v1383_v50 = vsel %vm1336_vm2, %v1335_v51, 0 }
 0x110   :  { %3795 = vmatpush3.msra.mxu1 %v4298_v5 }
 0x111   :  { %3846 = vmatprep.subr.mxu1 %v4298_v5  ;;  %v1479_v56 = vand.u32 4294901760, %v1478_v43  ;;  %v1519_v61 = vand.u32 4294901760, %v1518_v10  ;;  %v1567_v43 = vand.u32 4294901760, %v4573_v12 }
 0x112   :  { %3688 = vmatmul.mubr.f32.gmra.mxu0 %v4338_v1  ;;  %3748 = vmatmul.mubr.f32.gmra.mxu1 %v4458_v4  ;;  %v1488_v1 = vsub.f32 %v4479_v34, %v1487_v22 }
 0x113   :  { %3718 = vmatprep.mubr.f32.mxu0 %v1459_v62  ;;  %3750 = vmatprep.mubr.f32.mxu1 %v4467_v19  ;;  %v1529_v62 = vand.u32 4294901760, %v1528_v6  ;;  %v1579_v6 = vand.u32 4294901760, %v1578_v47 }
 0x114   :  { %v1489_v44 = vand.u32 4294901760, %v1488_v1  ;;  %v1548_v1 = vsub.f32 %v4553_v33, %v1547_v11 }
 0x116   :  { %3719 = vmatmul.mubr.f32.vlgmr.msra.gmra.mxu0 %v1469_v16  ;;  %3751 = vmatmul.mubr.f32.gmra.mxu1 %v4471_v21  ;;  %v4593_v16 = vand.u32 4294901760, %v1383_v50  ;;  %v1549_v10 = vand.u32 4294901760, %v1548_v1 }
 0x117   :  { %3769 = vmatpush3.msra.mxu0 %v4312_v17  ;;  %3721 = vmatprep.mubr.f32.mxu0 %v1479_v56  ;;  %v4560_v17 = vsub.f32 %v1368_v63, %v4534_v36  ;;  %v4591_v63 = vsub.f32 %v1377_v31, %v4575_v41  ;;  %v1539_v56 = vand.u32 4294901760, %v1538_v53  ;;  %v1597_v31 = vand.u32 4294901760, %v4600_v48 }
 0x118   :  { %3753 = vmatprep.mubr.f32.mxu1 %v4473_v26  ;;  %3820 = vmatprep.subr.mxu0 %v4329_v49  ;;  %v1606_v2 = vsub.f32 %v1383_v50, %v4593_v16 }
 0x119   :  { %v1557_v55 = vand.u32 4294901760, %v4560_v17  ;;  %v1587_v32 = vand.u32 4294901760, %v4591_v63  ;;  %v1598_v53 = vsub.f32 %v4600_v48, %v1597_v31 }
 0x11a   :  { %3722 = vmatmul.mubr.f32.gmra.mxu0 %v1489_v44  ;;  %3754 = vmatmul.mubr.f32.gmra.mxu1 %v4499_v9  ;;  %v1568_v44 = vsub.f32 %v4573_v12, %v1567_v43  ;;  %v1607_v51 = vand.u32 4294901760, %v1606_v2 }
 0x11b   :  { %3724 = vmatprep.mubr.f32.mxu0 %v1499_v45  ;;  %3756 = vmatprep.mubr.f32.mxu1 %v4507_v25  ;;  %v1558_v57 = vsub.f32 %v4560_v17, %v1557_v55  ;;  %v1599_v1 = vand.u32 4294901760, %v1598_v53 }
 0x11d   :  { %v1559_v45 = vand.u32 4294901760, %v1558_v57 }
 0x11e   :  { %3725 = vmatmul.mubr.f32.gmra.mxu0 %v1509_v59  ;;  %3757 = vmatmul.mubr.f32.gmra.mxu1 %v4529_v30  ;;  %v1569_v59 = vand.u32 4294901760, %v1568_v44 }
 0x11f   :  { %3727 = vmatprep.mubr.f32.mxu0 %v1519_v61  ;;  %3759 = vmatprep.mubr.f32.mxu1 %v4534_v36  ;;  %v1588_v61 = vsub.f32 %v4591_v63, %v1587_v32 }
 0x121   :  { %v1589_v50 = vand.u32 4294901760, %v1588_v61 }
 0x122   :  { %3728 = vmatmul.mubr.f32.gmra.mxu0 %v1529_v62  ;;  %3760 = vmatmul.mubr.f32.gmra.mxu1 %v4555_v40  ;;  %v1608_v62 = vsub.f32 %v1606_v2, %v1607_v51 }
 0x123   :  { %3730 = vmatprep.mubr.f32.mxu0 %v1539_v56  ;;  %3762 = vmatprep.mubr.f32.mxu1 %v4562_v27 }
 0x124   :  { %v1609_v56 = vand.u32 4294901760, %v1608_v62 }
 0x126   :  { %3731 = vmatmul.mubr.f32.gmra.mxu0 %v1549_v10  ;;  %3763 = vmatmul.mubr.f32.gmra.mxu1 %v4575_v41 }
 0x127   :  { %3733 = vmatprep.mubr.f32.mxu0 %v1559_v45  ;;  %3765 = vmatprep.mubr.f32.mxu1 %v4584_v20 }
 0x12a   :  { %3734 = vmatmul.mubr.f32.gmra.mxu0 %v1569_v59  ;;  %3766 = vmatmul.mubr.f32.gmra.mxu1 %v4593_v16 }
 0x12b   :  { %3736 = vmatprep.mubr.f32.mxu0 %v1579_v6  ;;  %3796 = vmatprep.mubr.f32.mxu1 %v1457_v14 }
 0x12e   :  { %3737 = vmatmul.mubr.f32.gmra.mxu0 %v1589_v50  ;;  %3797 = vmatmul.mubr.f32.vlgmr.msra.gmra.mxu1 %v1467_v29 }
 0x12f   :  { %3739 = vmatprep.mubr.f32.mxu0 %v1599_v1  ;;  %3799 = vmatprep.mubr.f32.mxu1 %v1477_v42 }
 0x130   :  { %3847 = vmatpush3.msra.mxu1 %v4298_v5 }
 0x131   :  { %3907 = vmatprep.subr.mxu1 %v5272_v0 }
 0x132   :  { %3740 = vmatmul.mubr.f32.gmra.mxu0 %v1609_v56  ;;  %3800 = vmatmul.mubr.f32.gmra.mxu1 %v1487_v22 }
 0x133   :  { %3770 = vmatprep.mubr.f32.mxu0 %v4443_v54  ;;  %3802 = vmatprep.mubr.f32.mxu1 %v1497_v39 }
 0x136   :  { %3771 = vmatmul.mubr.f32.vlgmr.msra.gmra.mxu0 %v4456_v3  ;;  %3803 = vmatmul.mubr.f32.gmra.mxu1 %v1507_v24 }
 0x137   :  { %3821 = vmatpush3.msra.mxu0 %v4329_v49  ;;  %3773 = vmatprep.mubr.f32.mxu0 %v4465_v18 }
 0x138   :  { %3805 = vmatprep.mubr.f32.mxu1 %v1517_v13  ;;  %3872 = vmatprep.subr.mxu0 %v5272_v0 }
 0x13a   :  { %3774 = vmatmul.mubr.f32.gmra.mxu0 %v4479_v34  ;;  %3806 = vmatmul.mubr.f32.gmra.mxu1 %v1527_v37 }
 0x13b   :  { %3776 = vmatprep.mubr.f32.mxu0 %v4485_v46  ;;  %3808 = vmatprep.mubr.f32.mxu1 %v1537_v28 }
 0x13e   :  { %3777 = vmatmul.mubr.f32.gmra.mxu0 %v4494_v7  ;;  %3809 = vmatmul.mubr.f32.gmra.mxu1 %v1547_v11 }
 0x13f   :  { %3779 = vmatprep.mubr.f32.mxu0 %v4497_v8  ;;  %3811 = vmatprep.mubr.f32.mxu1 %v1557_v55 }
 0x142   :  { %3780 = vmatmul.mubr.f32.gmra.mxu0 %v4523_v15  ;;  %3812 = vmatmul.mubr.f32.gmra.mxu1 %v1567_v43 }
 0x143   :  { %3782 = vmatprep.mubr.f32.mxu0 %v4527_v23  ;;  %3814 = vmatprep.mubr.f32.mxu1 %v1577_v35 }
 0x146   :  { %3783 = vmatmul.mubr.f32.gmra.mxu0 %v4553_v33  ;;  %3815 = vmatmul.mubr.f32.gmra.mxu1 %v1587_v32 }
 0x147   :  { %3785 = vmatprep.mubr.f32.mxu0 %v4560_v17  ;;  %3817 = vmatprep.mubr.f32.mxu1 %v1597_v31 }
 0x14a   :  { %3786 = vmatmul.mubr.f32.gmra.mxu0 %v4573_v12  ;;  %3818 = vmatmul.mubr.f32.gmra.mxu1 %v1607_v51 }
 0x14b   :  { %3788 = vmatprep.mubr.f32.mxu0 %v4582_v60  ;;  %3848 = vmatprep.mubr.f32.mxu1 %v4428_v38 }
 0x14e   :  { %3789 = vmatmul.mubr.f32.gmra.mxu0 %v4591_v63  ;;  %3849 = vmatmul.mubr.f32.vlgmr.msra.gmra.mxu1 %v4440_v52 }
 0x14f   :  { %3791 = vmatprep.mubr.f32.mxu0 %v4600_v48  ;;  %3851 = vmatprep.mubr.f32.mxu1 %v4445_v58 }
 0x152   :  { %3792 = vmatmul.mubr.f32.gmra.mxu0 %v1606_v2  ;;  %3852 = vmatmul.mubr.f32.gmra.mxu1 %v4458_v4  ;;  %v3590_v5 = vpop.f32.mrf.mxu1 }
 0x153   :  { %3822 = vmatprep.mubr.f32.mxu0 %v4428_v38  ;;  %3854 = vmatprep.mubr.f32.mxu1 %v4467_v19 }
 0x154   :  { %v439_v38 = vpop.f32.mrf.mxu1 }
 0x156   :  { %3823 = vmatmul.mubr.f32.vlgmr.msra.gmra.mxu0 %v4440_v52  ;;  %3855 = vmatmul.mubr.f32.gmra.mxu1 %v4471_v21 }
 0x157   :  { %3825 = vmatprep.mubr.f32.mxu0 %v4445_v58  ;;  %3857 = vmatprep.mubr.f32.mxu1 %v4473_v26 }
 0x15a   :  { %v3564_v49 = vpop.f32.mrf.mxu0  ;;  %3826 = vmatmul.mubr.f32.gmra.mxu0 %v4458_v4  ;;  %3858 = vmatmul.mubr.f32.gmra.mxu1 %v4499_v9  ;;  %v3593_v58 = vpop.f32.mrf.mxu1 }
 0x15b   :  { %v4670_v54 = vadd.f32 %v3590_v5, %v3564_v49  ;;  %3828 = vmatprep.mubr.f32.mxu0 %v4467_v19  ;;  %3860 = vmatprep.mubr.f32.mxu1 %v4507_v25 }
 0x15c   :  { %v213_v52 = vpop.f32.mrf.mxu0  ;;  %v451_v18 = vpop.f32.mrf.mxu1 }
 0x15d   :  { %v4674_v3 = vadd.f32 %v439_v38, %v213_v52 }
 0x15e   :  { %3829 = vmatmul.mubr.f32.gmra.mxu0 %v4471_v21  ;;  %3861 = vmatmul.mubr.f32.gmra.mxu1 %v4529_v30 }
 0x15f   :  { %3831 = vmatprep.mubr.f32.mxu0 %v4473_v26  ;;  %3863 = vmatprep.mubr.f32.mxu1 %v4534_v36 }
 0x162   :  { %v3567_v4 = vpop.f32.mrf.mxu0  ;;  %3832 = vmatmul.mubr.f32.gmra.mxu0 %v4499_v9  ;;  %3864 = vmatmul.mubr.f32.gmra.mxu1 %v4555_v40  ;;  %v3596_v26 = vpop.f32.mrf.mxu1 }
 0x163   :  { %v4682_v14 = vadd.f32 %v3593_v58, %v3567_v4  ;;  %3834 = vmatprep.mubr.f32.mxu0 %v4507_v25  ;;  %3866 = vmatprep.mubr.f32.mxu1 %v4562_v27 }
 0x164   :  { %v233_v19 = vpop.f32.mrf.mxu0  ;;  %v463_v42 = vpop.f32.mrf.mxu1 }
 0x165   :  { %v4686_v21 = vadd.f32 %v451_v18, %v233_v19 }
 0x166   :  { %3835 = vmatmul.mubr.f32.gmra.mxu0 %v4529_v30  ;;  %3867 = vmatmul.mubr.f32.gmra.mxu1 %v4575_v41 }
 0x167   :  { %3837 = vmatprep.mubr.f32.mxu0 %v4534_v36  ;;  %3869 = vmatprep.mubr.f32.mxu1 %v4584_v20 }
 0x16a   :  { %v3570_v29 = vpop.f32.mrf.mxu0  ;;  %3838 = vmatmul.mubr.f32.gmra.mxu0 %v4555_v40  ;;  %3870 = vmatmul.mubr.f32.gmra.mxu1 %v4593_v16  ;;  %v3599_v8 = vpop.f32.mrf.mxu1 }
 0x16b   :  { %v470_v34 = vadd.f32 %v3596_v26, %v3570_v29  ;;  %3840 = vmatprep.mubr.f32.mxu0 %v4562_v27 }
 0x16c   :  { %v253_v46 = vpop.f32.mrf.mxu0  ;;  %v475_v25 = vpop.f32.mrf.mxu1 }
 0x16d   :  { %v464_v7 = vadd.f32 %v463_v42, %v253_v46 }
 0x16e   :  { %3841 = vmatmul.mubr.f32.gmra.mxu0 %v4575_v41 }
 0x16f   :  { %3843 = vmatprep.mubr.f32.mxu0 %v4584_v20 }
 0x172   :  { %v3573_v9 = vpop.f32.mrf.mxu0  ;;  %3844 = vmatmul.mubr.f32.gmra.mxu0 %v4593_v16  ;;  %v3602_v13 = vpop.f32.mrf.mxu1 }
 0x173   :  { %v482_v22 = vadd.f32 %v3599_v8, %v3573_v9 }
 0x174   :  { %v273_v39 = vpop.f32.mrf.mxu0  ;;  %v487_v30 = vpop.f32.mrf.mxu1 }
 0x175   :  { %v476_v24 = vadd.f32 %v475_v25, %v273_v39 }
 0x17a   :  { %v3576_v15 = vpop.f32.mrf.mxu0  ;;  %v3605_v28 = vpop.f32.mrf.mxu1 }
 0x17b   :  { %v494_v23 = vadd.f32 %v3602_v13, %v3576_v15 }
 0x17c   :  { %v293_v36 = vpop.f32.mrf.mxu0  ;;  %v499_v33 = vpop.f32.mrf.mxu1 }
 0x17d   :  { %v488_v37 = vadd.f32 %v487_v30, %v293_v36 }
 0x182   :  { %v3579_v40 = vpop.f32.mrf.mxu0  ;;  %v3608_v27 = vpop.f32.mrf.mxu1 }
 0x183   :  { %v506_v17 = vadd.f32 %v3605_v28, %v3579_v40 }
 0x184   :  { %v313_v11 = vpop.f32.mrf.mxu0  ;;  %v511_v41 = vpop.f32.mrf.mxu1 }
 0x185   :  { %v500_v12 = vadd.f32 %v499_v33, %v313_v11 }
 0x18a   :  { %v3582_v55 = vpop.f32.mrf.mxu0  ;;  %v3611_v60 = vpop.f32.mrf.mxu1 }
 0x18b   :  { %v518_v20 = vadd.f32 %v3608_v27, %v3582_v55 }
 0x18c   :  { %v333_v43 = vpop.f32.mrf.mxu0  ;;  %v523_v63 = vpop.f32.mrf.mxu1 }
 0x18d   :  { %v512_v16 = vadd.f32 %v511_v41, %v333_v43 }
 0x18e   :  { %v3642_v35 = vpop.f32.mrf.mxu1 }
 0x190   :  { %v782_v48 = vpop.f32.mrf.mxu1 }
 0x192   :  { %v3585_v57 = vpop.f32.mrf.mxu0  ;;  %v3645_v32 = vpop.f32.mrf.mxu1 }
 0x193   :  { %v530_v2 = vadd.f32 %v3611_v60, %v3585_v57 }
 0x194   :  { %v353_v10 = vpop.f32.mrf.mxu0  ;;  %v798_v44 = vpop.f32.mrf.mxu1 }
 0x195   :  { %v524_v31 = vadd.f32 %v523_v63, %v353_v10 }
 0x196   :  { %v3616_v45 = vpop.f32.mrf.mxu0  ;;  %v3648_v47 = vpop.f32.mrf.mxu1 }
 0x197   :  { %v611_v51 = vadd.f32 %v3616_v45, %v4670_v54 }
 0x198   :  { %v603_v59 = vpop.f32.mrf.mxu0  ;;  %v814_v61 = vpop.f32.mrf.mxu1 }
 0x199   :  { %v604_v6 = vadd.f32 %v603_v59, %v4674_v3  ;;  %v791_v53 = vadd.f32 %v3642_v35, %v611_v51 }
 0x19a   :  { %v3619_v50 = vpop.f32.mrf.mxu0  ;;  %v3651_v62 = vpop.f32.mrf.mxu1 }
 0x19b   :  { %v625_v1 = vadd.f32 %v3619_v50, %v4682_v14  ;;  %v783_v56 = vadd.f32 %v782_v48, %v604_v6 }
 0x19c   :  { %v617_v5 = vpop.f32.mrf.mxu0  ;;  %v830_v49 = vpop.f32.mrf.mxu1 }
 0x19d   :  { %v618_v38 = vadd.f32 %v617_v5, %v4686_v21  ;;  %v807_v52 = vadd.f32 %v3645_v32, %v625_v1 }
 0x19e   :  { %v3622_v58 = vpop.f32.mrf.mxu0  ;;  %v3654_v4 = vpop.f32.mrf.mxu1 }
 0x19f   :  { %v639_v18 = vadd.f32 %v3622_v58, %v470_v34  ;;  %v799_v19 = vadd.f32 %v798_v44, %v618_v38 }
 0x1a0   :  { %v631_v54 = vpop.f32.mrf.mxu0  ;;  %v846_v26 = vpop.f32.mrf.mxu1 }
 0x1a1   :  { %v632_v29 = vadd.f32 %v631_v54, %v464_v7  ;;  %v823_v42 = vadd.f32 %v3648_v47, %v639_v18 }
 0x1a2   :  { %v3625_v3 = vpop.f32.mrf.mxu0  ;;  %v3657_v46 = vpop.f32.mrf.mxu1 }
 0x1a3   :  { %v653_v8 = vadd.f32 %v3625_v3, %v482_v22  ;;  %v815_v9 = vadd.f32 %v814_v61, %v632_v29 }
 0x1a4   :  { %v645_v25 = vpop.f32.mrf.mxu0  ;;  %v862_v14 = vpop.f32.mrf.mxu1 }
 0x1a5   :  { %v646_v39 = vadd.f32 %v645_v25, %v476_v24  ;;  %v839_v13 = vadd.f32 %v3651_v62, %v653_v8 }
 0x1a6   :  { %v3628_v15 = vpop.f32.mrf.mxu0  ;;  %v3660_v30 = vpop.f32.mrf.mxu1 }
 0x1a7   :  { %v667_v21 = vadd.f32 %v3628_v15, %v494_v23  ;;  %v831_v36 = vadd.f32 %v830_v49, %v646_v39 }
 0x1a8   :  { %v659_v28 = vpop.f32.mrf.mxu0  ;;  %v878_v33 = vpop.f32.mrf.mxu1 }
 0x1a9   :  { %v660_v34 = vadd.f32 %v659_v28, %v488_v37  ;;  %v855_v40 = vadd.f32 %v3654_v4, %v667_v21 }
 0x1aa   :  { %v3631_v27 = vpop.f32.mrf.mxu0  ;;  %v3663_v11 = vpop.f32.mrf.mxu1 }
 0x1ab   :  { %v681_v7 = vadd.f32 %v3631_v27, %v506_v17  ;;  %v847_v41 = vadd.f32 %v846_v26, %v660_v34 }
 0x1ac   :  { %v673_v55 = vpop.f32.mrf.mxu0  ;;  %v894_v60 = vpop.f32.mrf.mxu1 }
 0x1ad   :  { %v674_v22 = vadd.f32 %v673_v55, %v500_v12  ;;  %v871_v43 = vadd.f32 %v3657_v46, %v681_v7 }
 0x1ae   :  { %v3634_v63 = vpop.f32.mrf.mxu0  ;;  %v3694_v35 = vpop.f32.mrf.mxu1 }
 0x1af   :  { %v695_v24 = vadd.f32 %v3634_v63, %v518_v20  ;;  %v863_v48 = vadd.f32 %v862_v14, %v674_v22 }
 0x1b0   :  { %v687_v57 = vpop.f32.mrf.mxu0  ;;  %v1138_v32 = vpop.f32.mrf.mxu1 }
 0x1b1   :  { %v688_v23 = vadd.f32 %v687_v57, %v512_v16  ;;  %v887_v10 = vadd.f32 %v3660_v30, %v695_v24 }
 0x1b2   :  { %v3637_v44 = vpop.f32.mrf.mxu0  ;;  %v3697_v45 = vpop.f32.mrf.mxu1 }
 0x1b3   :  { %v709_v37 = vadd.f32 %v3637_v44, %v530_v2  ;;  %v879_v47 = vadd.f32 %v878_v33, %v688_v23 }
 0x1b4   :  { %v701_v51 = vpop.f32.mrf.mxu0  ;;  %v1150_v59 = vpop.f32.mrf.mxu1 }
 0x1b5   :  { %v702_v17 = vadd.f32 %v701_v51, %v524_v31  ;;  %v903_v61 = vadd.f32 %v3663_v11, %v709_v37 }
 0x1b6   :  { %v3668_v6 = vpop.f32.mrf.mxu0  ;;  %v3700_v50 = vpop.f32.mrf.mxu1 }
 0x1b7   :  { %v983_v12 = vadd.f32 %v3668_v6, %v791_v53  ;;  %v895_v62 = vadd.f32 %v894_v60, %v702_v17 }
 0x1b8   :  { %v976_v1 = vpop.f32.mrf.mxu0  ;;  %v1162_v5 = vpop.f32.mrf.mxu1 }
 0x1b9   :  { %v4702_v20 = vadd.f32 %v3694_v35, %v983_v12  ;;  %v977_v49 = vadd.f32 %v976_v1, %v783_v56 }
 0x1ba   :  { %v3671_v38 = vpop.f32.mrf.mxu0  ;;  %v3703_v16 = vpop.f32.mrf.mxu1 }
 0x1bb   :  { %v4704_v58 = vadd.f32 %v1138_v32, %v977_v49  ;;  %v995_v4 = vadd.f32 %v3671_v38, %v807_v52 }
 0x1bc   :  { %v988_v2 = vpop.f32.mrf.mxu0  ;;  %v1174_v18 = vpop.f32.mrf.mxu1 }
 0x1bd   :  { %v4706_v54 = vadd.f32 %v3697_v45, %v995_v4  ;;  %v989_v31 = vadd.f32 %v988_v2, %v799_v19 }
 0x1be   :  { %v3674_v26 = vpop.f32.mrf.mxu0  ;;  %v3706_v29 = vpop.f32.mrf.mxu1 }
 0x1bf   :  { %v4708_v3 = vadd.f32 %v1150_v59, %v989_v31  ;;  %v1007_v53 = vadd.f32 %v3674_v26, %v823_v42 }
 0x1c0   :  { %v1000_v46 = vpop.f32.mrf.mxu0  ;;  %v1186_v8 = vpop.f32.mrf.mxu1 }
 0x1c1   :  { %v4710_v25 = vadd.f32 %v3700_v50, %v1007_v53  ;;  %v1001_v56 = vadd.f32 %v1000_v46, %v815_v9 }
 0x1c2   :  { %v3677_v14 = vpop.f32.mrf.mxu0  ;;  %v3709_v39 = vpop.f32.mrf.mxu1 }
 0x1c3   :  { %v4712_v15 = vadd.f32 %v1162_v5, %v1001_v56  ;;  %v1019_v52 = vadd.f32 %v3677_v14, %v839_v13 }
 0x1c4   :  { %v1012_v30 = vpop.f32.mrf.mxu0  ;;  %v1198_v21 = vpop.f32.mrf.mxu1 }
 0x1c5   :  { %v4714_v28 = vadd.f32 %v3703_v16, %v1019_v52  ;;  %v1013_v19 = vadd.f32 %v1012_v30, %v831_v36 }
 0x1c6   :  { %v3680_v33 = vpop.f32.mrf.mxu0  ;;  %v3712_v34 = vpop.f32.mrf.mxu1 }
 0x1c7   :  { %v4716_v27 = vadd.f32 %v1174_v18, %v1013_v19  ;;  %v1031_v42 = vadd.f32 %v3680_v33, %v855_v40 }
 0x1c8   :  { %v1024_v11 = vpop.f32.mrf.mxu0  ;;  %v1210_v7 = vpop.f32.mrf.mxu1 }
 0x1c9   :  { %5275 = vst [vmem:[#allocation11_spill] sm:$0xff] %v4716_v27  ;;  %v4718_v55 = vadd.f32 %v3706_v29, %v1031_v42  ;;  %v1025_v9 = vadd.f32 %v1024_v11, %v847_v41 }
 0x1ca   :  { %v3683_v60 = vpop.f32.mrf.mxu0  ;;  %v3715_v22 = vpop.f32.mrf.mxu1 }
 0x1cb   :  { %5276 = vst [vmem:[#allocation12_spill] sm:$0xff] %v4718_v55  ;;  %v4720_v63 = vadd.f32 %v1186_v8, %v1025_v9  ;;  %v1043_v13 = vadd.f32 %v3683_v60, %v871_v43 }
 0x1cc   :  { %v1036_v35 = vpop.f32.mrf.mxu0  ;;  %v1222_v24 = vpop.f32.mrf.mxu1 }
 0x1cd   :  { %5277 = vst [vmem:[#allocation13_spill] sm:$0xff] %v4720_v63  ;;  %v4722_v57 = vadd.f32 %v3709_v39, %v1043_v13  ;;  %v1037_v36 = vadd.f32 %v1036_v35, %v863_v48 }
 0x1ce   :  { %v3686_v32 = vpop.f32.mrf.mxu0  ;;  %v3746_v23 = vpop.f32.mrf.mxu1 }
 0x1cf   :  { %5278 = vst [vmem:[#allocation14_spill] sm:$0xff] %v4722_v57  ;;  %v4724_v44 = vadd.f32 %v1198_v21, %v1037_v36  ;;  %v1055_v40 = vadd.f32 %v3686_v32, %v887_v10 }
 0x1d0   :  { %v1048_v45 = vpop.f32.mrf.mxu0  ;;  %v1687_v37 = vpop.f32.mrf.mxu1 }
 0x1d1   :  { %5279 = vst [vmem:[#allocation15_spill] sm:$0xff] %v4724_v44  ;;  %v4726_v51 = vadd.f32 %v3712_v34, %v1055_v40  ;;  %v1049_v41 = vadd.f32 %v1048_v45, %v879_v47 }
 0x1d2   :  { %v3689_v59 = vpop.f32.mrf.mxu0  ;;  %v3749_v17 = vpop.f32.mrf.mxu1 }
 0x1d3   :  { %5280 = vst [vmem:[#allocation16_spill] sm:$0xff] %v4726_v51  ;;  %v4728_v6 = vadd.f32 %v1210_v7, %v1049_v41  ;;  %v1067_v43 = vadd.f32 %v3689_v59, %v903_v61 }
 0x1d4   :  { %v1060_v50 = vpop.f32.mrf.mxu0  ;;  %v1699_v12 = vpop.f32.mrf.mxu1 }
 0x1d5   :  { %5281 = vst [vmem:[#allocation17_spill] sm:$0xff] %v4728_v6  ;;  %v4730_v1 = vadd.f32 %v3715_v22, %v1067_v43  ;;  %v1061_v48 = vadd.f32 %v1060_v50, %v895_v62 }
 0x1d6   :  { %v3720_v5 = vpop.f32.mrf.mxu0  ;;  %v3752_v49 = vpop.f32.mrf.mxu1 }
 0x1d7   :  { %5282 = vst [vmem:[#allocation18_spill] sm:$0xff] %v4730_v1  ;;  %v4732_v38 = vadd.f32 %v1222_v24, %v1061_v48  ;;  %v1694_v10 = vadd.f32 %v3746_v23, %v3720_v5 }
 0x1d8   :  { %v1461_v16 = vpop.f32.mrf.mxu0  ;;  %v1711_v4 = vpop.f32.mrf.mxu1 }
 0x1d9   :  { %5283 = vst [vmem:[#allocation19_spill] sm:$0xff] %v4732_v38  ;;  %v1688_v2 = vadd.f32 %v1687_v37, %v1461_v16 }
 0x1da   :  { %v3723_v18 = vpop.f32.mrf.mxu0  ;;  %v4734_v47 = vpop.f32.mrf.mxu1 }
 0x1db   :  { %v1706_v31 = vadd.f32 %v3749_v17, %v3723_v18 }
 0x1dc   :  { %v1481_v26 = vpop.f32.mrf.mxu0  ;;  %v1723_v29 = vpop.f32.mrf.mxu1 }
 0x1dd   :  { %v1700_v61 = vadd.f32 %v1699_v12, %v1481_v26 }
 0x1de   :  { %v3726_v53 = vpop.f32.mrf.mxu0  ;;  %v4736_v46 = vpop.f32.mrf.mxu1 }
 0x1df   :  { %v1718_v8 = vadd.f32 %v3752_v49, %v3726_v53 }
 0x1e0   :  { %v1501_v62 = vpop.f32.mrf.mxu0  ;;  %v4738_v56 = vpop.f32.mrf.mxu1 }
 0x1e1   :  { %v1712_v14 = vadd.f32 %v1711_v4, %v1501_v62 }
 0x1e2   :  { %v4740_v39 = vpop.f32.mrf.mxu0  ;;  %v4742_v52 = vpop.f32.mrf.mxu1 }
 0x1e4   :  { %v1521_v30 = vpop.f32.mrf.mxu0  ;;  %v4744_v21 = vpop.f32.mrf.mxu1 }
 0x1e5   :  { %v4746_v19 = vadd.f32 %v1723_v29, %v1521_v30 }
 0x1e6   :  { %v4748_v33 = vpop.f32.mrf.mxu0  ;;  %v3764_v34 = vpop.f32.mrf.mxu1 }
 0x1e8   :  { %v4750_v42 = vpop.f32.mrf.mxu0  ;;  %v1759_v11 = vpop.f32.mrf.mxu1 }
 0x1ea   :  { %v4752_v7 = vpop.f32.mrf.mxu0  ;;  %v3767_v9 = vpop.f32.mrf.mxu1 }
 0x1ec   :  { %v4754_v60 = vpop.f32.mrf.mxu0  ;;  %v1771_v22 = vpop.f32.mrf.mxu1 }
 0x1ee   :  { %v3738_v13 = vpop.f32.mrf.mxu0  ;;  %v3798_v35 = vpop.f32.mrf.mxu1 }
 0x1ef   :  { %v4756_v24 = vadd.f32 %v3764_v34, %v3738_v13 }
 0x1f0   :  { %v1581_v36 = vpop.f32.mrf.mxu0  ;;  %v2030_v32 = vpop.f32.mrf.mxu1 }
 0x1f1   :  { %v4758_v23 = vadd.f32 %v1759_v11, %v1581_v36 }
 0x1f2   :  { %v3741_v40 = vpop.f32.mrf.mxu0  ;;  %v3801_v45 = vpop.f32.mrf.mxu1 }
 0x1f3   :  { %v4760_v37 = vadd.f32 %v3767_v9, %v3741_v40 }
 0x1f4   :  { %v1601_v41 = vpop.f32.mrf.mxu0  ;;  %v2046_v59 = vpop.f32.mrf.mxu1 }
 0x1f5   :  { %5284 = vst [vmem:[#allocation20_spill] sm:$0xff] %v4760_v37  ;;  %v4762_v17 = vadd.f32 %v1771_v22, %v1601_v41 }
 0x1f6   :  { %v3772_v43 = vpop.f32.mrf.mxu0  ;;  %v3804_v50 = vpop.f32.mrf.mxu1 }
 0x1f7   :  { %5285 = vst [vmem:[#allocation21_spill] sm:$0xff] %v4762_v17  ;;  %v1859_v12 = vadd.f32 %v3772_v43, %v1694_v10 }
 0x1f8   :  { %v1851_v48 = vpop.f32.mrf.mxu0  ;;  %v2062_v5 = vpop.f32.mrf.mxu1 }
 0x1f9   :  { %v1852_v49 = vadd.f32 %v1851_v48, %v1688_v2  ;;  %v2039_v16 = vadd.f32 %v3798_v35, %v1859_v12 }
 0x1fa   :  { %v3775_v4 = vpop.f32.mrf.mxu0  ;;  %v4764_v18 = vpop.f32.mrf.mxu1 }
 0x1fb   :  { %v1873_v26 = vadd.f32 %v3775_v4, %v1706_v31  ;;  %v2031_v29 = vadd.f32 %v2030_v32, %v1852_v49  ;;  %v1303_v4 = vld [vmem:[#allocation4] sm:$0x1] }
 0x1fc   :  { %v1865_v53 = vpop.f32.mrf.mxu0  ;;  %v4766_v62 = vpop.f32.mrf.mxu1 }
 0x1fd   :  { %v1866_v30 = vadd.f32 %v1865_v53, %v1700_v61  ;;  %v2055_v34 = vadd.f32 %v3801_v45, %v1873_v26  ;;  %v4088_v61 = vld [vmem:[#allocation3] sm:$0x1] }
 0x1fe   :  { %v3778_v11 = vpop.f32.mrf.mxu0  ;;  %v4768_v9 = vpop.f32.mrf.mxu1  ;;  %v2512_v45 = vmul.f32 %v4088_v61, %v4088_v61 }
 0x1ff   :  { %v1887_v22 = vadd.f32 %v3778_v11, %v1718_v8  ;;  %v2047_v13 = vadd.f32 %v2046_v59, %v1866_v30 }
 0x200   :  { %v1879_v10 = vpop.f32.mrf.mxu0  ;;  %v4770_v36 = vpop.f32.mrf.mxu1  ;;  %v2513_v49 = vmul.f32 0.125, %v2512_v45 }
 0x201   :  { %v1880_v2 = vadd.f32 %v1879_v10, %v1712_v14  ;;  %v2071_v35 = vadd.f32 %v3804_v50, %v1887_v22 }
 0x202   :  { %v3781_v40 = vpop.f32.mrf.mxu0  ;;  %v4772_v41 = vpop.f32.mrf.mxu1  ;;  %v4792_v53 = vsub.f32 %v1303_v4, %v2513_v49 }
 0x203   :  { %v4774_v31 = vadd.f32 %v2062_v5, %v1880_v2 }
 0x204   :  { %v1893_v32 = vpop.f32.mrf.mxu0  ;;  %v4776_v43 = vpop.f32.mrf.mxu1  ;;  %5290 = vst [vmem:[#allocation26_spill] sm:$0xff] %v4792_v53  ;;  %v2515_v2 = vmul.f32 0.14285715, %v4792_v53 }
 0x206   :  { %v3784_v12 = vpop.f32.mrf.mxu0  ;;  %v4778_v48 = vpop.f32.mrf.mxu1  ;;  %v2516_v1 = vadd.f32 1e-08, %v2515_v2 }
 0x207   :  { %5286 = vst [vmem:[#allocation22_spill] sm:$0xff] %v4778_v48 }
 0x208   :  { %v4780_v8 = vpop.f32.mrf.mxu0  ;;  %v4782_v59 = vpop.f32.mrf.mxu1  ;;  %4086 = vrcp.f32 %v2516_v1  ;;  %v1742_v1 = vadd.f32 %v4736_v46, %v4748_v33 }
 0x209   :  { %5287 = vst [vmem:[#allocation23_spill] sm:$0xff] %v4782_v59 }
 0x20a   :  { %v4784_v14 = vpop.f32.mrf.mxu0  ;;  %v4786_v50 = vpop.f32.mrf.mxu1 }
 0x20b   :  { %5288 = vst [vmem:[#allocation24_spill] sm:$0xff] %v4786_v50  ;;  %v1730_v50 = vadd.f32 %v4734_v47, %v4740_v39  ;;  %v1894_v47 = vadd.f32 %v1893_v32, %v4746_v19 }
 0x20c   :  { %v4788_v5 = vpop.f32.mrf.mxu0  ;;  %v4790_v26 = vpop.f32.mrf.mxu1 }
 0x20d   :  { %5289 = vst [vmem:[#allocation25_spill] sm:$0xff] %v4790_v26  ;;  %v1901_v27 = vadd.f32 %v3781_v40, %v1730_v50  ;;  %v1915_v40 = vadd.f32 %v3784_v12, %v1742_v1 }
 0x20e   :  { %v4794_v30 = vpop.f32.mrf.mxu0  ;;  %v3850_v11 = vpop.f32.mrf.mxu1 }
 0x20f   :  { %v2103_v12 = vadd.f32 %v4768_v9, %v1915_v40 }
 0x210   :  { %v4796_v22 = vpop.f32.mrf.mxu0  ;;  %v2386_v10 = vpop.f32.mrf.mxu1 }
 0x212   :  { %v4799_v61 = vpop.f32.mrf.mxu0  ;;  %v3853_v45 = vpop.f32.mrf.mxu1 }
 0x213   :  { %5291 = vst [vmem:[#allocation27_spill] sm:$0xff] %v4799_v61 }
 0x214   :  { %v4801_v0 = vpop.f32.mrf.mxu0  ;;  %v2398_v38 = vpop.f32.mrf.mxu1 }
 0x215   :  { %5292 = vst [vmem:[#allocation28_spill] sm:$0xff] %v4801_v0 }
 0x216   :  { %v3824_v6 = vpop.f32.mrf.mxu0  ;;  %v3856_v51 = vpop.f32.mrf.mxu1 }
 0x217   :  { %v2231_v44 = vadd.f32 %v3824_v6, %v2039_v16 }
 0x218   :  { %v2224_v49 = vpop.f32.mrf.mxu0  ;;  %v2410_v4 = vpop.f32.mrf.mxu1 }
 0x219   :  { %v2393_v26 = vadd.f32 %v3850_v11, %v2231_v44  ;;  %v2225_v57 = vadd.f32 %v2224_v49, %v2031_v29  ;;  %v2536_v44 = vlaneseq }
 0x21a   :  { %v3827_v63 = vpop.f32.mrf.mxu0  ;;  %v3859_v53 = vpop.f32.mrf.mxu1 }
 0x21b   :  { %v2481_v55 = vmul.f32 0.125, %v2393_v26  ;;  %v2387_v59 = vadd.f32 %v2386_v10, %v2225_v57  ;;  %v2243_v17 = vadd.f32 %v3827_v63, %v2055_v34  ;;  %v1736_v34 = vadd.f32 %v4738_v56, %v4750_v42 }
 0x21c   :  { %v2236_v0 = vpop.f32.mrf.mxu0  ;;  %v2422_v48 = vpop.f32.mrf.mxu1 }
 0x21d   :  { %v2480_v2 = vmul.f32 0.125, %v2387_v59  ;;  %v2405_v61 = vadd.f32 %v3853_v45, %v2243_v17  ;;  %v2237_v37 = vadd.f32 %v2236_v0, %v2047_v13  ;;  %v4806_v6 = vsub.f32 %v4702_v20, %v2481_v55 }
 0x21e   :  { %v3830_v39 = vpop.f32.mrf.mxu0  ;;  %v3862_v16 = vpop.f32.mrf.mxu1  ;;  %v2087_v20 = vadd.f32 %v4764_v18, %v1901_v27  ;;  %v1908_v27 = vadd.f32 %v4780_v8, %v1736_v34  ;;  %v5296_v34 = vld [vmem:[#allocation11_spill] sm:$0xff] }
 0x21f   :  { %v2483_v29 = vmul.f32 0.125, %v2405_v61  ;;  %v2399_v57 = vadd.f32 %v2398_v38, %v2237_v37  ;;  %v2255_v63 = vadd.f32 %v3830_v39, %v2071_v35  ;;  %v4815_v55 = vsub.f32 %v4704_v58, %v2480_v2  ;;  %v5293_v39 = vld [vmem:[#allocation20_spill] sm:$0xff] }
 0x220   :  { %v2248_v17 = vpop.f32.mrf.mxu0  ;;  %v2434_v0 = vpop.f32.mrf.mxu1  ;;  %v2537_v38 = vshrl.u32 %v2536_v44, 7  ;;  %v1754_v37 = vadd.f32 %v4742_v52, %v4752_v7  ;;  %v2079_v35 = vadd.f32 %v4766_v62, %v1894_v47  ;;  %v2095_v9 = vadd.f32 %v4770_v36, %v1908_v27 }
 0x221   :  { %v2482_v13 = vmul.f32 0.125, %v2399_v57  ;;  %v2417_v46 = vadd.f32 %v3856_v51, %v2255_v63  ;;  %v2249_v19 = vadd.f32 %v2248_v17, %v4774_v31  ;;  %v4819_v33 = vsub.f32 %v4706_v54, %v2483_v29  ;;  %v5294_v29 = vld [vmem:[#allocation27_spill] sm:$0xff]  ;;  %v5295_v63 = vld [vmem:[#allocation22_spill] sm:$0xff] }
 0x222   :  { %v3833_v56 = vpop.f32.mrf.mxu0  ;;  %v3865_v42 = vpop.f32.mrf.mxu1  ;;  %v1748_v51 = vadd.f32 %v4744_v21, %v4754_v60  ;;  %v1929_v31 = vadd.f32 %v4784_v14, %v1754_v37  ;;  %v2538_v8 = vsub.s32 0, %v2537_v38  ;;  %v1936_v36 = vadd.f32 %v4796_v22, %v4758_v23  ;;  %v5299_v38 = vld [vmem:[#allocation23_spill] sm:$0xff] }
 0x223   :  { %v2485_v18 = vmul.f32 0.125, %v2417_v46  ;;  %v2411_v58 = vadd.f32 %v2410_v4, %v2249_v19  ;;  %v2267_v32 = vadd.f32 %v3833_v56, %v2087_v20  ;;  %v4830_v59 = vsub.f32 %v4708_v3, %v2482_v13  ;;  %v4836_v21 = vpop.eup %4086  ;;  %v5297_v13 = vld [vmem:[#allocation21_spill] sm:$0xff]  ;;  %v5300_v56 = vld [vmem:[#allocation12_spill] sm:$0xff] }
 0x224   :  { %v2260_v54 = vpop.f32.mrf.mxu0  ;;  %v1922_v26 = vadd.f32 %v4788_v5, %v1748_v51  ;;  %v2446_v11 = vpop.f32.mrf.mxu1  ;;  %v1943_v3 = vadd.f32 %v4794_v30, %v4756_v24  ;;  %v2119_v45 = vadd.f32 %v4772_v41, %v1929_v31  ;;  %v4847_v44 = vrot.slane %v4836_v21, %v2538_v8 }
 0x225   :  { %v2484_v52 = vmul.f32 0.125, %v2411_v58  ;;  %v2429_v7 = vadd.f32 %v3859_v53, %v2267_v32  ;;  %v2261_v50 = vadd.f32 %v2260_v54, %v2079_v35  ;;  %v4833_v62 = vsub.f32 %v4710_v25, %v2485_v18  ;;  %v5301_v32 = vld [vmem:[#allocation13_spill] sm:$0xff] }
 0x226   :  { %v3836_v10 = vpop.f32.mrf.mxu0  ;;  %v2111_v24 = vadd.f32 %v4776_v43, %v1922_v26  ;;  %v5298_v43 = vld [vmem:[#allocation28_spill] sm:$0xff]  ;;  %v2127_v37 = vadd.f32 %v5299_v38, %v1936_v36 }
 0x227   :  { %v2487_v60 = vmul.f32 0.125, %v2429_v7  ;;  %v2423_v14 = vadd.f32 %v2422_v48, %v2261_v50  ;;  %v2279_v61 = vadd.f32 %v3836_v10, %v2103_v12  ;;  %v4843_v25 = vsub.f32 %v4712_v15, %v2484_v52  ;;  %v3868_v48 = vpop.f32.mrf.mxu1  ;;  %v5302_v7 = vld [vmem:[#allocation24_spill] sm:$0xff] }
 0x228   :  { %v2272_v53 = vpop.f32.mrf.mxu0  ;;  %v1950_v46 = vadd.f32 %v5298_v43, %v5297_v13 }
 0x229   :  { %v2486_v49 = vmul.f32 0.125, %v2423_v14  ;;  %v2441_v5 = vadd.f32 %v3862_v16, %v2279_v61  ;;  %v2273_v4 = vadd.f32 %v2272_v53, %v2095_v9  ;;  %v2503_v2 = vsub.f32 %v4714_v28, %v2487_v60  ;;  %v5303_v14 = vld [vmem:[#allocation14_spill] sm:$0xff]  ;;  %v5304_v53 = vld [vmem:[#allocation25_spill] sm:$0xff] }
 0x22a   :  { %v3839_v1 = vpop.f32.mrf.mxu0  ;;  %v1957_v16 = vadd.f32 %v5294_v29, %v5293_v39  ;;  %v2135_v28 = vadd.f32 %v5295_v63, %v1943_v3  ;;  %v5307_v29 = vld [vmem:[#allocation17_spill] sm:$0xff]  ;;  %v5308_v63 = vld [vmem:[#allocation18_spill] sm:$0xff] }
 0x22b   :  { %v2489_v30 = vmul.f32 0.125, %v2441_v5  ;;  %v2435_v41 = vadd.f32 %v2434_v0, %v2273_v4  ;;  %v2291_v47 = vadd.f32 %v3839_v1, %v2119_v45  ;;  %v2526_v15 = vmul.f32 %v2503_v2, %v2503_v2  ;;  %v2458_v0 = vpop.f32.mrf.mxu1  ;;  %v5305_v5 = vld [vmem:[#allocation15_spill] sm:$0xff]  ;;  %v5306_v1 = vld [vmem:[#allocation16_spill] sm:$0xff] }
 0x22c   :  { %v2284_v57 = vpop.f32.mrf.mxu0  ;;  %v4856_v40 = vsub.f32 %v5296_v34, %v2486_v49  ;;  %v2151_v50 = vadd.f32 %v5302_v7, %v1957_v16  ;;  %v2143_v45 = vadd.f32 %v5304_v53, %v1950_v46 }
 0x22d   :  { %v2488_v17 = vmul.f32 0.125, %v2435_v41  ;;  %v2453_v20 = vadd.f32 %v3865_v42, %v2291_v47  ;;  %v2285_v23 = vadd.f32 %v2284_v57, %v2111_v24  ;;  %v2548_v22 = vmul.f32 %v4847_v44, %v2526_v15  ;;  %v3871_v8 = vpop.f32.mrf.mxu1 }
 0x22e   :  { %v3842_v19 = vpop.f32.mrf.mxu0  ;;  %v2505_v35 = vsub.f32 %v5300_v56, %v2489_v30 }
 0x22f   :  { %v2491_v27 = vmul.f32 0.125, %v2453_v20  ;;  %v2447_v18 = vadd.f32 %v2446_v11, %v2285_v23  ;;  %v2303_v58 = vadd.f32 %v3842_v19, %v2135_v28  ;;  %2571 = vadd.xlane.f32.xlu1 %v2548_v22  ;;  %v2504_v51 = vsub.f32 %v5301_v32, %v2488_v17  ;;  %v2470_v30 = vpop.f32.mrf.mxu1  ;;  %v5309_v20 = vld [vmem:[#allocation19_spill] sm:$0xff] }
 0x230   :  { %v2296_v31 = vpop.f32.mrf.mxu0  ;;  %v2528_v42 = vmul.f32 %v2505_v35, %v2505_v35  ;;  %v2525_v35 = vmul.f32 %v4856_v40, %v4856_v40  ;;  %v2523_v32 = vmul.f32 %v4843_v25, %v4843_v25 }
 0x231   :  { %v2490_v54 = vmul.f32 0.125, %v2447_v18  ;;  %v2465_v12 = vadd.f32 %v3868_v48, %v2303_v58  ;;  %v2297_v52 = vadd.f32 %v2296_v31, %v2127_v37  ;;  %v2527_v60 = vmul.f32 %v2504_v51, %v2504_v51 }
 0x232   :  { %v3845_v26 = vpop.f32.mrf.mxu0  ;;  %v2550_v10 = vmul.f32 %v4847_v44, %v2528_v42  ;;  %v2507_v61 = vsub.f32 %v5303_v14, %v2491_v27  ;;  %v2547_v27 = vmul.f32 %v4847_v44, %v2525_v35  ;;  %v2524_v18 = vmul.f32 %v4833_v62, %v4833_v62 }
 0x233   :  { %v2493_v9 = vmul.f32 0.125, %v2465_v12  ;;  %v2459_v11 = vadd.f32 %v2458_v0, %v2297_v52  ;;  %v2315_v3 = vadd.f32 %v3845_v26, %v2151_v50  ;;  %v2506_v4 = vsub.f32 %v5305_v5, %v2490_v54 }
 0x234   :  { %2575 = vadd.xlane.f32.xlu1 %v2550_v10  ;;  %v2308_v49 = vpop.f32.mrf.mxu0  ;;  %v2549_v41 = vmul.f32 %v4847_v44, %v2527_v60  ;;  %v2530_v47 = vmul.f32 %v2507_v61, %v2507_v61  ;;  %v2546_v58 = vmul.f32 %v4847_v44, %v2524_v18  ;;  %v2545_v51 = vmul.f32 %v4847_v44, %v2523_v32 }
 0x235   :  { %v2492_v2 = vmul.f32 0.125, %v2459_v11  ;;  %v2477_v36 = vadd.f32 %v3871_v8, %v2315_v3  ;;  %v2309_v48 = vadd.f32 %v2308_v49, %v2143_v45  ;;  %v2509_v24 = vsub.f32 %v5306_v1, %v2493_v9  ;;  %v5311_v8 = vld [vmem:[#allocation26_spill] sm:$0xff] }
 0x236   :  { %v2552_v34 = vmul.f32 %v4847_v44, %v2530_v47  ;;  %v2529_v17 = vmul.f32 %v2506_v4, %v2506_v4  ;;  %v2522_v31 = vmul.f32 %v4819_v33, %v4819_v33  ;;  %v2521_v42 = vmul.f32 %v4830_v59, %v4830_v59 }
 0x237   :  { %v2495_v15 = vmul.f32 0.125, %v2477_v36  ;;  %v2471_v39 = vadd.f32 %v2470_v30, %v2309_v48  ;;  %v2508_v16 = vsub.f32 %v5307_v29, %v2492_v2  ;;  %v2532_v13 = vmul.f32 %v2509_v24, %v2509_v24 }
 0x238   :  { %2573 = vadd.xlane.f32.xlu1 %v2549_v41  ;;  %v2551_v22 = vmul.f32 %v4847_v44, %v2529_v17  ;;  %v2544_v40 = vmul.f32 %v4847_v44, %v2522_v31  ;;  %v2543_v62 = vmul.f32 %v4847_v44, %v2521_v42  ;;  %v2520_v54 = vmul.f32 %v4806_v6, %v4806_v6 }
 0x239   :  { %v2494_v57 = vmul.f32 0.125, %v2471_v39  ;;  %v2511_v28 = vsub.f32 %v5308_v63, %v2495_v15  ;;  %v2554_v43 = vmul.f32 %v4847_v44, %v2532_v13  ;;  %v2531_v46 = vmul.f32 %v2508_v16, %v2508_v16 }
 0x23a   :  { %v2542_v25 = vmul.f32 %v4847_v44, %v2520_v54  ;;  %v2519_v12 = vmul.f32 %v4815_v55, %v4815_v55  ;;  %v5310_v52 = vmov 0.0   ;;  %v3230_v26 = vmul.f32 %v4836_v21, %v5311_v8 }
 0x23b   :  { %v2510_v23 = vsub.f32 %v5309_v20, %v2494_v57  ;;  %v2553_v0 = vmul.f32 %v4847_v44, %v2531_v46  ;;  %v2534_v19 = vmul.f32 %v2511_v28, %v2511_v28  ;;  %3904 = vmatprep.mubr.msk.f32.mxu0 %vm4135_vm3, %v5310_v52  ;;  %3939 = vmatprep.mubr.msk.f32.mxu1 %vm4135_vm3, %v5310_v52  ;;  %v4995_v32 = vand.u32 4294901760, %v4836_v21 }
 0x23c   :  { %2579 = vadd.xlane.f32.xlu1 %v2552_v34  ;;  %v2541_v33 = vmul.f32 %v4847_v44, %v2519_v12  ;;  %v3231_v10 = vmul.f32 %v3230_v26, %v3230_v26 }
 0x23d   :  { %v2556_v38 = vmul.f32 %v4847_v44, %v2534_v19  ;;  %v2533_v37 = vmul.f32 %v2510_v23, %v2510_v23 }
 0x23e   :  { %v3232_v60 = vsel %vm1385_vm1, %v3231_v10, 0.0 }
 0x23f   :  { %v2555_v56 = vmul.f32 %v4847_v44, %v2533_v37 }
 0x240   :  { %2577 = vadd.xlane.f32.xlu1 %v2551_v22 }
 0x244   :  { %2583 = vadd.xlane.f32.xlu1 %v2554_v43 }
 0x248   :  { %2581 = vadd.xlane.f32.xlu1 %v2553_v0 }
 0x24c   :  { %2587 = vadd.xlane.f32.xlu1 %v2556_v38 }
 0x250   :  { %2585 = vadd.xlane.f32.xlu1 %v2555_v56 }
 0x254   :  { %2569 = vadd.xlane.f32.xlu1 %v2547_v27 }
 0x258   :  { %2567 = vadd.xlane.f32.xlu1 %v2546_v58 }
 0x25c   :  { %2565 = vadd.xlane.f32.xlu1 %v2545_v51 }
 0x260   :  { %2563 = vadd.xlane.f32.xlu1 %v2544_v40 }
 0x264   :  { %2561 = vadd.xlane.f32.xlu1 %v2543_v62 }
 0x268   :  { %2559 = vadd.xlane.f32.xlu1 %v2542_v25 }
 0x26c   :  { %2557 = vadd.xlane.f32.xlu1 %v2541_v33 }
 0x270   :  { %3233 = vadd.xlane.f32.xlu1 %v3232_v60 }
 0x2b8   :  { %v2572_v59 = vpop.xlane.xlu1 %2571 }
 0x2b9   :  { %v4954_v28 = vand.u32 4294901760, %v2572_v59 }
 0x2bb   :  { %v4981_v38 = vsub.f32 %v2572_v59, %v4954_v28 }
 0x2bd   :  { %v2576_v7 = vpop.xlane.xlu1 %2575  ;;  %v2739_v62 = vand.u32 4294901760, %v4981_v38 }
 0x2be   :  { %v4932_v1 = vand.u32 4294901760, %v2576_v7 }
 0x2c0   :  { %v4958_v34 = vsub.f32 %v2576_v7, %v4932_v1  ;;  %v5023_v7 = vsub.f32 %v4836_v21, %v4995_v32  ;;  %v2740_v21 = vsub.f32 %v4981_v38, %v2739_v62 }
 0x2c1   :  { %v2574_v6 = vpop.xlane.xlu1 %2573 }
 0x2c2   :  { %v4945_v15 = vand.u32 4294901760, %v2574_v6  ;;  %v2725_v37 = vand.u32 4294901760, %v4958_v34 }
 0x2c4   :  { %v4969_v22 = vsub.f32 %v2574_v6, %v4945_v15  ;;  %v2726_v54 = vsub.f32 %v4958_v34, %v2725_v37 }
 0x2c5   :  { %v2580_v50 = vpop.xlane.xlu1 %2579 }
 0x2c6   :  { %v4914_v53 = vand.u32 4294901760, %v2580_v50  ;;  %v2732_v18 = vand.u32 4294901760, %v4969_v22  ;;  %v2727_v10 = vand.u32 4294901760, %v2726_v54 }
 0x2c8   :  { %v4935_v24 = vsub.f32 %v2580_v50, %v4914_v53  ;;  %v2733_v33 = vsub.f32 %v4969_v22, %v2732_v18 }
 0x2c9   :  { %v2578_v55 = vpop.xlane.xlu1 %2577 }
 0x2ca   :  { %v4924_v4 = vand.u32 4294901760, %v2578_v55  ;;  %v2711_v17 = vand.u32 4294901760, %v4935_v24 }
 0x2cc   :  { %v4949_v29 = vsub.f32 %v2578_v55, %v4924_v4  ;;  %v2712_v56 = vsub.f32 %v4935_v24, %v2711_v17 }
 0x2cd   :  { %v2584_v44 = vpop.xlane.xlu1 %2583 }
 0x2ce   :  { %v4908_v61 = vand.u32 4294901760, %v2584_v44  ;;  %v2718_v43 = vand.u32 4294901760, %v4949_v29  ;;  %v2713_v25 = vand.u32 4294901760, %v2712_v56 }
 0x2d0   :  { %v4917_v45 = vsub.f32 %v2584_v44, %v4908_v61  ;;  %v2719_v51 = vsub.f32 %v4949_v29, %v2718_v43 }
 0x2d1   :  { %v2582_v14 = vpop.xlane.xlu1 %2581 }
 0x2d2   :  { %v4910_v11 = vand.u32 4294901760, %v2582_v14  ;;  %v2697_v30 = vand.u32 4294901760, %v4917_v45  ;;  %v2720_v6 = vand.u32 4294901760, %v2719_v51 }
 0x2d4   :  { %v4927_v2 = vsub.f32 %v2582_v14, %v4910_v11  ;;  %v2698_v20 = vsub.f32 %v4917_v45, %v2697_v30  ;;  %v2672_v14 = vand.u32 4294901760, %v5023_v7 }
 0x2d5   :  { %v2588_v9 = vpop.xlane.xlu1 %2587 }
 0x2d6   :  { %v4912_v3 = vand.u32 4294901760, %v2588_v9  ;;  %v2704_v16 = vand.u32 4294901760, %v4927_v2  ;;  %v2699_v35 = vand.u32 4294901760, %v2698_v20 }
 0x2d8   :  { %v4920_v49 = vsub.f32 %v2588_v9, %v4912_v3  ;;  %3873 = vmatpush3.msra.mxu0 %v4912_v3  ;;  %v2705_v46 = vsub.f32 %v4927_v2, %v2704_v16  ;;  %v2734_v9 = vand.u32 4294901760, %v2733_v33 }
 0x2d9   :  { %v2586_v5 = vpop.xlane.xlu1 %2585  ;;  %3874 = vmatprep.subr.mxu0 %v5310_v52 }
 0x2da   :  { %v2683_v36 = vand.u32 4294901760, %v4920_v49  ;;  %v4930_v48 = vand.u32 4294901760, %v2586_v5  ;;  %v2706_v31 = vand.u32 4294901760, %v2705_v46 }
 0x2dc   :  { %v2684_v41 = vsub.f32 %v4920_v49, %v2683_v36  ;;  %v4942_v47 = vsub.f32 %v2586_v5, %v4930_v48  ;;  %3875 = vmatpush3.msra.mxu0 %v4930_v48 }
 0x2dd   :  { %3876 = vmatprep.subr.mxu0 %v5310_v52  ;;  %v2570_v39 = vpop.xlane.xlu1 %2569 }
 0x2de   :  { %v2685_v57 = vand.u32 4294901760, %v2684_v41  ;;  %v2690_v63 = vand.u32 4294901760, %v4942_v47  ;;  %3877 = vmatpush3.msra.mxu0 %v4908_v61  ;;  %v4977_v19 = vand.u32 4294901760, %v2570_v39 }
 0x2df   :  { %3878 = vmatprep.subr.mxu0 %v5310_v52 }
 0x2e0   :  { %v2691_v23 = vsub.f32 %v4942_v47, %v2690_v63  ;;  %3879 = vmatpush3.msra.mxu0 %v4910_v11  ;;  %3908 = vmatpush3.msra.mxu1 %v2685_v57  ;;  %v5001_v40 = vsub.f32 %v2570_v39, %v4977_v19  ;;  %v2741_v57 = vand.u32 4294901760, %v2740_v21 }
 0x2e1   :  { %3880 = vmatprep.subr.mxu0 %v5310_v52  ;;  %v2568_v13 = vpop.xlane.xlu1 %2567  ;;  %3909 = vmatprep.subr.mxu1 %v5310_v52 }
 0x2e2   :  { %v2692_v0 = vand.u32 4294901760, %v2691_v23  ;;  %3881 = vmatpush3.msra.mxu0 %v4914_v53  ;;  %v4988_v27 = vand.u32 4294901760, %v2568_v13  ;;  %v2746_v50 = vand.u32 4294901760, %v5001_v40 }
 0x2e3   :  { %3882 = vmatprep.subr.mxu0 %v5310_v52 }
 0x2e4   :  { %3883 = vmatpush3.msra.mxu0 %v4924_v4  ;;  %3910 = vmatpush3.msra.mxu1 %v2692_v0  ;;  %v5013_v12 = vsub.f32 %v2568_v13, %v4988_v27  ;;  %v2747_v5 = vsub.f32 %v5001_v40, %v2746_v50  ;;  %v2673_v0 = vsub.f32 %v5023_v7, %v2672_v14 }
 0x2e5   :  { %3884 = vmatprep.subr.mxu0 %v5310_v52  ;;  %3911 = vmatprep.subr.mxu1 %v5310_v52  ;;  %v2566_v58 = vpop.xlane.xlu1 %2565 }
 0x2e6   :  { %v5003_v42 = vand.u32 4294901760, %v2566_v58  ;;  %3885 = vmatpush3.msra.mxu0 %v4932_v1  ;;  %3912 = vmatpush3.msra.mxu1 %v2699_v35  ;;  %v2753_v55 = vand.u32 4294901760, %v5013_v12  ;;  %v2748_v56 = vand.u32 4294901760, %v2747_v5 }
 0x2e7   :  { %3886 = vmatprep.subr.mxu0 %v5310_v52  ;;  %3913 = vmatprep.subr.mxu1 %v5310_v52 }
 0x2e8   :  { %3887 = vmatpush3.msra.mxu0 %v4945_v15  ;;  %3914 = vmatpush3.msra.mxu1 %v2706_v31  ;;  %v5027_v8 = vsub.f32 %v2566_v58, %v5003_v42  ;;  %v2754_v20 = vsub.f32 %v5013_v12, %v2753_v55 }
 0x2e9   :  { %3888 = vmatprep.subr.mxu0 %v5310_v52  ;;  %3915 = vmatprep.subr.mxu1 %v5310_v52  ;;  %v2564_v59 = vpop.xlane.xlu1 %2563 }
 0x2ea   :  { %v5029_v26 = vand.u32 4294901760, %v2564_v59  ;;  %3889 = vmatpush3.msra.mxu0 %v4954_v28  ;;  %3916 = vmatpush3.msra.mxu1 %v2713_v25  ;;  %v2760_v41 = vand.u32 4294901760, %v5027_v8  ;;  %v2755_v31 = vand.u32 4294901760, %v2754_v20 }
 0x2eb   :  { %3890 = vmatprep.subr.mxu0 %v5310_v52  ;;  %3917 = vmatprep.subr.mxu1 %v5310_v52 }
 0x2ec   :  { %v5039_v60 = vsub.f32 %v2564_v59, %v5029_v26  ;;  %3891 = vmatpush3.msra.mxu0 %v4977_v19  ;;  %3918 = vmatpush3.msra.mxu1 %v2720_v6  ;;  %v2761_v35 = vsub.f32 %v5027_v8, %v2760_v41  ;;  %v2674_v59 = vand.u32 4294901760, %v2673_v0 }
 0x2ed   :  { %3892 = vmatprep.subr.mxu0 %v5310_v52  ;;  %3919 = vmatprep.subr.mxu1 %v5310_v52  ;;  %v2562_v44 = vpop.xlane.xlu1 %2561 }
 0x2ee   :  { %v5049_v39 = vand.u32 4294901760, %v2562_v44  ;;  %3893 = vmatpush3.msra.mxu0 %v4988_v27  ;;  %3920 = vmatpush3.msra.mxu1 %v2727_v10  ;;  %v2767_v23 = vand.u32 4294901760, %v5039_v60  ;;  %v2762_v6 = vand.u32 4294901760, %v2761_v35 }
 0x2ef   :  { %3894 = vmatprep.subr.mxu0 %v5310_v52  ;;  %3921 = vmatprep.subr.mxu1 %v5310_v52 }
 0x2f0   :  { %v5059_v13 = vsub.f32 %v2562_v44, %v5049_v39  ;;  %3895 = vmatpush3.msra.mxu0 %v5003_v42  ;;  %3922 = vmatpush3.msra.mxu1 %v2734_v9  ;;  %v2768_v54 = vsub.f32 %v5039_v60, %v2767_v23 }
 0x2f1   :  { %3896 = vmatprep.subr.mxu0 %v5310_v52  ;;  %3923 = vmatprep.subr.mxu1 %v5310_v52  ;;  %v2560_v46 = vpop.xlane.xlu1 %2559 }
 0x2f2   :  { %v2774_v58 = vand.u32 4294901760, %v5059_v13  ;;  %v5071_v51 = vand.u32 4294901760, %v2560_v46  ;;  %3897 = vmatpush3.msra.mxu0 %v5029_v26  ;;  %3924 = vmatpush3.msra.mxu1 %v2741_v57  ;;  %v2769_v9 = vand.u32 4294901760, %v2768_v54 }
 0x2f3   :  { %3898 = vmatprep.subr.mxu0 %v5310_v52  ;;  %3925 = vmatprep.subr.mxu1 %v5310_v52 }
 0x2f4   :  { %v5080_v25 = vsub.f32 %v2560_v46, %v5071_v51  ;;  %3899 = vmatpush3.msra.mxu0 %v5049_v39  ;;  %3926 = vmatpush3.msra.mxu1 %v2748_v56  ;;  %v2775_v21 = vsub.f32 %v5059_v13, %v2774_v58 }
 0x2f5   :  { %3900 = vmatprep.subr.mxu0 %v5310_v52  ;;  %3927 = vmatprep.subr.mxu1 %v5310_v52  ;;  %v2558_v33 = vpop.xlane.xlu1 %2557 }
 0x2f6   :  { %v2781_v10 = vand.u32 4294901760, %v5080_v25  ;;  %v5089_v44 = vand.u32 4294901760, %v2558_v33  ;;  %3901 = vmatpush3.msra.mxu0 %v5071_v51  ;;  %3928 = vmatpush3.msra.mxu1 %v2755_v31  ;;  %v2776_v20 = vand.u32 4294901760, %v2775_v21 }
 0x2f7   :  { %3902 = vmatprep.subr.mxu0 %v5310_v52  ;;  %3929 = vmatprep.subr.mxu1 %v5310_v52 }
 0x2f8   :  { %v2782_v5 = vsub.f32 %v5080_v25, %v2781_v10  ;;  %v5098_v57 = vsub.f32 %v2558_v33, %v5089_v44  ;;  %3903 = vmatpush3.msra.mxu0 %v5089_v44  ;;  %3930 = vmatpush3.msra.mxu1 %v2762_v6 }
 0x2f9   :  { %3931 = vmatprep.subr.mxu1 %v5310_v52  ;;  %3942 = vmatprep.subr.mxu0 %v5310_v52 }
 0x2fa   :  { %v2788_v46 = vand.u32 4294901760, %v5098_v57  ;;  %3905 = vmatmul.mubr.f32.vlgmr.msra.gmra.mxu0 %v2674_v59  ;;  %3932 = vmatpush3.msra.mxu1 %v2769_v9  ;;  %v2783_v0 = vand.u32 4294901760, %v2782_v5 }
 0x2fb   :  { %3943 = vmatpush3.msra.mxu0 %v4920_v49  ;;  %3933 = vmatprep.subr.mxu1 %v5310_v52 }
 0x2fc   :  { %v2789_v56 = vsub.f32 %v5098_v57, %v2788_v46  ;;  %3944 = vmatprep.subr.mxu0 %v5310_v52  ;;  %3934 = vmatpush3.msra.mxu1 %v2776_v20 }
 0x2fd   :  { %3945 = vmatpush3.msra.mxu0 %v4942_v47  ;;  %3935 = vmatprep.subr.mxu1 %v5310_v52 }
 0x2fe   :  { %v2790_v35 = vand.u32 4294901760, %v2789_v56  ;;  %3946 = vmatprep.subr.mxu0 %v5310_v52  ;;  %3936 = vmatpush3.msra.mxu1 %v2783_v0 }
 0x2ff   :  { %3947 = vmatpush3.msra.mxu0 %v4917_v45  ;;  %3937 = vmatprep.subr.mxu1 %v5310_v52 }
 0x300   :  { %3948 = vmatprep.subr.mxu0 %v5310_v52  ;;  %3938 = vmatpush3.msra.mxu1 %v2790_v35 }
 0x301   :  { %3949 = vmatpush3.msra.mxu0 %v4927_v2  ;;  %3940 = vmatmul.mubr.f32.vlgmr.msra.gmra.mxu1 %v4995_v32 }
 0x302   :  { %3950 = vmatprep.subr.mxu0 %v5310_v52  ;;  %3977 = vmatprep.subr.mxu1 %v5310_v52 }
 0x303   :  { %3951 = vmatpush3.msra.mxu0 %v4935_v24  ;;  %3978 = vmatpush3.msra.mxu1 %v4912_v3 }
 0x304   :  { %3952 = vmatprep.subr.mxu0 %v5310_v52  ;;  %3979 = vmatprep.subr.mxu1 %v5310_v52 }
 0x305   :  { %3953 = vmatpush3.msra.mxu0 %v4949_v29  ;;  %3980 = vmatpush3.msra.mxu1 %v4930_v48 }
 0x306   :  { %3954 = vmatprep.subr.mxu0 %v5310_v52  ;;  %3981 = vmatprep.subr.mxu1 %v5310_v52 }
 0x307   :  { %3955 = vmatpush3.msra.mxu0 %v4958_v34  ;;  %3982 = vmatpush3.msra.mxu1 %v4908_v61 }
 0x308   :  { %3956 = vmatprep.subr.mxu0 %v5310_v52  ;;  %3983 = vmatprep.subr.mxu1 %v5310_v52 }
 0x309   :  { %3957 = vmatpush3.msra.mxu0 %v4969_v22  ;;  %3984 = vmatpush3.msra.mxu1 %v4910_v11 }
 0x30a   :  { %3958 = vmatprep.subr.mxu0 %v5310_v52  ;;  %3985 = vmatprep.subr.mxu1 %v5310_v52 }
 0x30b   :  { %3959 = vmatpush3.msra.mxu0 %v4981_v38  ;;  %3986 = vmatpush3.msra.mxu1 %v4914_v53 }
 0x30c   :  { %3960 = vmatprep.subr.mxu0 %v5310_v52  ;;  %3987 = vmatprep.subr.mxu1 %v5310_v52 }
 0x30d   :  { %3961 = vmatpush3.msra.mxu0 %v5001_v40  ;;  %3988 = vmatpush3.msra.mxu1 %v4924_v4 }
 0x30e   :  { %3962 = vmatprep.subr.mxu0 %v5310_v52  ;;  %3989 = vmatprep.subr.mxu1 %v5310_v52 }
 0x30f   :  { %3963 = vmatpush3.msra.mxu0 %v5013_v12  ;;  %3990 = vmatpush3.msra.mxu1 %v4932_v1 }
 0x310   :  { %3964 = vmatprep.subr.mxu0 %v5310_v52  ;;  %3991 = vmatprep.subr.mxu1 %v5310_v52 }
 0x311   :  { %3965 = vmatpush3.msra.mxu0 %v5027_v8  ;;  %3992 = vmatpush3.msra.mxu1 %v4945_v15 }
 0x312   :  { %3966 = vmatprep.subr.mxu0 %v5310_v52  ;;  %3993 = vmatprep.subr.mxu1 %v5310_v52 }
 0x313   :  { %3967 = vmatpush3.msra.mxu0 %v5039_v60  ;;  %3994 = vmatpush3.msra.mxu1 %v4954_v28 }
 0x314   :  { %3968 = vmatprep.subr.mxu0 %v5310_v52  ;;  %3995 = vmatprep.subr.mxu1 %v5310_v52 }
 0x315   :  { %3969 = vmatpush3.msra.mxu0 %v5059_v13  ;;  %3996 = vmatpush3.msra.mxu1 %v4977_v19 }
 0x316   :  { %3970 = vmatprep.subr.mxu0 %v5310_v52  ;;  %3997 = vmatprep.subr.mxu1 %v5310_v52 }
 0x317   :  { %3971 = vmatpush3.msra.mxu0 %v5080_v25  ;;  %3998 = vmatpush3.msra.mxu1 %v4988_v27 }
 0x318   :  { %3972 = vmatprep.subr.mxu0 %v5310_v52  ;;  %3999 = vmatprep.subr.mxu1 %v5310_v52 }
 0x319   :  { %3973 = vmatpush3.msra.mxu0 %v5098_v57  ;;  %3974 = vmatprep.mubr.msk.f32.mxu0 %vm4135_vm3, %v5310_v52 }
 0x31a   :  { %4000 = vmatpush3.msra.mxu1 %v5003_v42  ;;  %3975 = vmatmul.mubr.f32.vlgmr.msra.gmra.mxu0 %v5023_v7 }
 0x31b   :  { %4001 = vmatprep.subr.mxu1 %v5310_v52  ;;  %4012 = vmatprep.subr.mxu0 %v5310_v52 }
 0x31c   :  { %4002 = vmatpush3.msra.mxu1 %v5029_v26  ;;  %4013 = vmatpush3.msra.mxu0 %v2683_v36 }
 0x31d   :  { %4003 = vmatprep.subr.mxu1 %v5310_v52  ;;  %4014 = vmatprep.subr.mxu0 %v5310_v52 }
 0x31e   :  { %4004 = vmatpush3.msra.mxu1 %v5049_v39  ;;  %4015 = vmatpush3.msra.mxu0 %v2690_v63 }
 0x31f   :  { %4005 = vmatprep.subr.mxu1 %v5310_v52  ;;  %4016 = vmatprep.subr.mxu0 %v5310_v52 }
 0x320   :  { %4006 = vmatpush3.msra.mxu1 %v5071_v51  ;;  %4017 = vmatpush3.msra.mxu0 %v2697_v30 }
 0x321   :  { %4007 = vmatprep.subr.mxu1 %v5310_v52  ;;  %4018 = vmatprep.subr.mxu0 %v5310_v52 }
 0x322   :  { %4008 = vmatpush3.msra.mxu1 %v5089_v44  ;;  %4009 = vmatprep.mubr.msk.f32.mxu1 %vm4135_vm3, %v5310_v52 }
 0x323   :  { %4019 = vmatpush3.msra.mxu0 %v2704_v16  ;;  %4010 = vmatmul.mubr.f32.vlgmr.msra.gmra.mxu1 %v2672_v14 }
 0x324   :  { %4020 = vmatprep.subr.mxu0 %v5310_v52  ;;  %4047 = vmatprep.subr.mxu1 %v5310_v52 }
 0x325   :  { %4021 = vmatpush3.msra.mxu0 %v2711_v17  ;;  %4048 = vmatpush3.msra.mxu1 %v4912_v3 }
 0x326   :  { %4022 = vmatprep.subr.mxu0 %v5310_v52  ;;  %4049 = vmatprep.subr.mxu1 %v5310_v52 }
 0x327   :  { %4023 = vmatpush3.msra.mxu0 %v2718_v43  ;;  %4050 = vmatpush3.msra.mxu1 %v4930_v48 }
 0x328   :  { %4024 = vmatprep.subr.mxu0 %v5310_v52  ;;  %4051 = vmatprep.subr.mxu1 %v5310_v52 }
 0x329   :  { %4025 = vmatpush3.msra.mxu0 %v2725_v37  ;;  %4052 = vmatpush3.msra.mxu1 %v4908_v61 }
 0x32a   :  { %4026 = vmatprep.subr.mxu0 %v5310_v52  ;;  %4053 = vmatprep.subr.mxu1 %v5310_v52 }
 0x32b   :  { %4027 = vmatpush3.msra.mxu0 %v2732_v18  ;;  %4054 = vmatpush3.msra.mxu1 %v4910_v11 }
 0x32c   :  { %4028 = vmatprep.subr.mxu0 %v5310_v52  ;;  %4055 = vmatprep.subr.mxu1 %v5310_v52 }
 0x32d   :  { %4029 = vmatpush3.msra.mxu0 %v2739_v62  ;;  %4056 = vmatpush3.msra.mxu1 %v4914_v53 }
 0x32e   :  { %4030 = vmatprep.subr.mxu0 %v5310_v52  ;;  %4057 = vmatprep.subr.mxu1 %v5310_v52 }
 0x32f   :  { %4031 = vmatpush3.msra.mxu0 %v2746_v50  ;;  %4058 = vmatpush3.msra.mxu1 %v4924_v4 }
 0x330   :  { %4032 = vmatprep.subr.mxu0 %v5310_v52  ;;  %4059 = vmatprep.subr.mxu1 %v5310_v52 }
 0x331   :  { %4033 = vmatpush3.msra.mxu0 %v2753_v55  ;;  %4060 = vmatpush3.msra.mxu1 %v4932_v1 }
 0x332   :  { %4034 = vmatprep.subr.mxu0 %v5310_v52  ;;  %4061 = vmatprep.subr.mxu1 %v5310_v52 }
 0x333   :  { %4035 = vmatpush3.msra.mxu0 %v2760_v41  ;;  %4062 = vmatpush3.msra.mxu1 %v4945_v15 }
 0x334   :  { %4036 = vmatprep.subr.mxu0 %v5310_v52  ;;  %4063 = vmatprep.subr.mxu1 %v5310_v52 }
 0x335   :  { %4037 = vmatpush3.msra.mxu0 %v2767_v23  ;;  %4064 = vmatpush3.msra.mxu1 %v4954_v28 }
 0x336   :  { %4038 = vmatprep.subr.mxu0 %v5310_v52  ;;  %4065 = vmatprep.subr.mxu1 %v5310_v52 }
 0x337   :  { %4039 = vmatpush3.msra.mxu0 %v2774_v58  ;;  %4066 = vmatpush3.msra.mxu1 %v4977_v19 }
 0x338   :  { %4040 = vmatprep.subr.mxu0 %v5310_v52  ;;  %4067 = vmatprep.subr.mxu1 %v5310_v52 }
 0x339   :  { %4041 = vmatpush3.msra.mxu0 %v2781_v10  ;;  %4068 = vmatpush3.msra.mxu1 %v4988_v27 }
 0x33a   :  { %4042 = vmatprep.subr.mxu0 %v5310_v52  ;;  %4069 = vmatprep.subr.mxu1 %v5310_v52 }
 0x33b   :  { %4043 = vmatpush3.msra.mxu0 %v2788_v46  ;;  %4044 = vmatprep.mubr.msk.f32.mxu0 %vm4135_vm3, %v5310_v52 }
 0x33c   :  { %4070 = vmatpush3.msra.mxu1 %v5003_v42  ;;  %4045 = vmatmul.mubr.f32.vlgmr.msra.gmra.mxu0 %v4995_v32 }
 0x33d   :  { %4071 = vmatprep.subr.mxu1 %v5310_v52  ;;  %4079 = vmatprep.mubr.msk.f32.mxu1 %vm4135_vm3, %v5310_v52 }
 0x33e   :  { %4072 = vmatpush3.msra.mxu1 %v5029_v26 }
 0x33f   :  { %4073 = vmatprep.subr.mxu1 %v5310_v52 }
 0x340   :  { %4074 = vmatpush3.msra.mxu1 %v5049_v39 }
 0x341   :  { %4075 = vmatprep.subr.mxu1 %v5310_v52 }
 0x342   :  { %4076 = vmatpush3.msra.mxu1 %v5071_v51 }
 0x343   :  { %4077 = vmatprep.subr.mxu1 %v5310_v52  ;;  %v3234_v52 = vpop.xlane.xlu1 %3233 }
 0x344   :  { %4078 = vmatpush3.msra.mxu1 %v5089_v44 }
 0x345   :  { %4080 = vmatmul.mubr.f32.vlgmr.msra.gmra.mxu1 %v4995_v32 }
 0x3ba   :  { %v2676_v61 = vpop.f32.mrf.mxu0 }
 0x3bc   :  { %v3906_v11 = vpop.f32.mrf.mxu0 }
 0x3c1   :  { %v2827_v3 = vpop.f32.mrf.mxu1 }
 0x3c2   :  { %v2828_v48 = vadd.f32 %v2827_v3, %v2676_v61 }
 0x3c3   :  { %v3941_v53 = vpop.f32.mrf.mxu1 }
 0x3da   :  { %v2931_v45 = vpop.f32.mrf.mxu0 }
 0x3db   :  { %v2932_v24 = vadd.f32 %v2931_v45, %v2828_v48 }
 0x3dc   :  { %v3976_v49 = vpop.f32.mrf.mxu0 }
 0x3e3   :  { %v3020_v4 = vpop.f32.mrf.mxu1 }
 0x3e4   :  { %v3021_v30 = vadd.f32 %v3020_v4, %v2932_v24 }
 0x3e5   :  { %v4011_v2 = vpop.f32.mrf.mxu1 }
 0x3fc   :  { %v3139_v36 = vpop.f32.mrf.mxu0 }
 0x3fd   :  { %v3140_v47 = vadd.f32 %v3139_v36, %v3021_v30 }
 0x3fe   :  { %v4046_v1 = vpop.f32.mrf.mxu0 }
 0x405   :  { %v3226_v15 = vpop.f32.mrf.mxu1 }
 0x406   :  { %v3227_v29 = vadd.f32 %v3226_v15, %v3140_v47 }
 0x407   :  { %v4081_v16 = vpop.f32.mrf.mxu1 }
 0x408   :  { %v3235_v63 = vsub.f32 %v3227_v29, %v3234_v52 }
 0x40a   :  { %v3236_v28 = vmul.f32 0.00012600806, %v3235_v63 }
 0x40c   :  { %3238 = vst.msk [vmem:[#allocation8] sm:$0x1] %vm3237_vm4, %v3236_v28 }
 0x40d   :  { %4120 = shalt.err (!%p4117_p9)
}
 0x40e   :  { %3248 = dma.vmem_to_hbm [thread:$0]  %s3246_s11, 16, %s5271_s1, [#allocation7]  }
 0x40f   :  { %4131 = dma.done.wait [#allocation7], 16  }
 0x410   :  { %4132 = vsyncadd [#allocation7], 4294967280 }
 0x411   :  { %3252 = vsyncpa [#allocation6], 1 }
 0x412   :  { %3253 = vsyncpa [#allocation7], 1 }

</bundles_post_ra>
